<compile_context>
chip_gen: v5e
topology: v5e:2x2
jax: 0.10.0
libtpu: 0.0.40
codegen_flags: <defaults>
</compile_context>

<pallas_src>
import functools
import math

import jax
import jax.numpy as jnp
from jax.experimental import pallas as pl
from jax.experimental.pallas import tpu as pltpu


# --------------------------------------------------------------------------
# Fused encoder-layer kernel: one grid step == one batch tile (all heads).
# --------------------------------------------------------------------------
def _layernorm(x, g, b, eps):
    mean = jnp.mean(x, axis=-1, keepdims=True)
    xc = x - mean
    var = jnp.mean(xc * xc, axis=-1, keepdims=True)      # biased, like torch LN
    return xc * jax.lax.rsqrt(var + eps) * g + b


def _encoder_layer_kernel(src_ref, wqkv_ref, bqkv_ref, wo_ref, bo_ref,
                          g1_ref, be1_ref, w1_ref, b1_ref, w2_ref, b2_ref,
                          g2_ref, be2_ref, out_ref, *, nhead, eps):
    L, bt, E = src_ref.shape
    hd = E // nhead
    cd = wqkv_ref.dtype            # MXU compute dtype (weights pre-cast outside)

    # ---- build a batch-major (bt*L, E) activation matrix (rows n*L + l) -----
    # The DMA delivered the (L, bt, E) block straight from (L, N, E): no host
    # transpose; the tiny reorder happens once in VMEM.
    x3 = src_ref[...]
    x_parts = [x3[:, n, :].astype(jnp.float32) for n in range(bt)]    # bt x (L, E)
    x2 = x_parts[0] if bt == 1 else jnp.concatenate(x_parts, axis=0)  # (bt*L, E)

    # ---- fused QKV projection: one (bt*L, E) @ (E, 3E) matmul ---------------
    # (1/sqrt(head_dim) already folded into Wq / bq in prepare_params.)
    qkv = jnp.dot(x2.astype(cd), wqkv_ref[...],
                  preferred_element_type=jnp.float32) + bqkv_ref[...]  # f32

    # ---- attention per (batch, head); heads reassembled along lanes, then ---
    # ---- ONE out-projection matmul over the full E contraction --------------
    o_parts = []
    for n in range(bt):
        r0 = n * L
        heads = []
        for h in range(nhead):
            c = h * hd
            qh = qkv[r0:r0 + L, c:c + hd].astype(cd)                   # (L, hd)
            kh = qkv[r0:r0 + L, E + c:E + c + hd].astype(cd)           # (L, hd)
            vh = qkv[r0:r0 + L, 2 * E + c:2 * E + c + hd].astype(cd)   # (L, hd)
            s = jax.lax.dot_general(qh, kh, (((1,), (1,)), ((), ())),
                                    preferred_element_type=jnp.float32)  # (L, L)
            m = jnp.max(s, axis=-1, keepdims=True)
            p = jnp.exp(s - m)
            denom = jnp.sum(p, axis=-1, keepdims=True)
            p = p * pl.reciprocal(denom, approx=True)      # EUP slot, ~free
            heads.append(jnp.dot(p.astype(cd), vh,
                                 preferred_element_type=jnp.float32))  # (L, hd)
        o_parts.append(heads[0] if nhead == 1
                       else jnp.concatenate(heads, axis=1))            # (L, E)
    o2 = o_parts[0] if bt == 1 else jnp.concatenate(o_parts, axis=0)   # (bt*L, E)
    attn2 = jnp.dot(o2.astype(cd), wo_ref[...],
                    preferred_element_type=jnp.float32) + bo_ref[...]  # (bt*L, E)

    # ---- module quirk: residual = attn_output[seq pos 0] of each batch ------
    # ---- element, broadcast over the sequence --------------------------------
    y_parts = [x_parts[n] + attn2[n * L:n * L + 1, :] for n in range(bt)]
    y2 = y_parts[0] if bt == 1 else jnp.concatenate(y_parts, axis=0)   # (bt*L, E)

    # ---- norm1, fused FFN (hidden never leaves VMEM), norm2 ------------------
    y1 = _layernorm(y2, g1_ref[...], be1_ref[...], eps)                # f32
    hid = jnp.maximum(
        jnp.dot(y1.astype(cd), w1_ref[...],
                preferred_element_type=jnp.float32) + b1_ref[...], 0.0)  # (bt*L, F)
    ff = jnp.dot(hid.astype(cd), w2_ref[...],
                 preferred_element_type=jnp.float32) + b2_ref[...]       # (bt*L, E)
    out2 = _layernorm(y1 + ff, g2_ref[...], be2_ref[...], eps)

    # ---- store back in (L, bt, E) layout (-> (L, N, E) output, no transpose) -
    for n in range(bt):
        out_ref[:, n:n + 1, :] = (
            out2[n * L:(n + 1) * L, :].astype(out_ref.dtype)[:, None, :])


def transformer_encoder_layer(src, prep, nhead, *, batch_tile=None):
    """src: (L, N, E).  prep: output of prepare_params.  Returns (L, N, E)."""
    L, N, E = src.shape
    F_dim = prep["w1"].shape[1]

    if batch_tile is None:
        # Fold the whole batch into the matmul M dimension (single grid step).
        # For large batches on v7x, pass batch_tile = N // 2 (must divide N and
        # keep the second-minor block dim aligned) so both TensorCores run.
        batch_tile = N
    assert N % batch_tile == 0, "batch_tile must divide N"
    num_tiles = N // batch_tile

    kernel = functools.partial(_encoder_layer_kernel, nhead=nhead, eps=1e-5)

    def full_spec(shape):
        return pl.BlockSpec(shape, lambda b, n=len(shape): (0,) * n)

    in_specs = [
        pl.BlockSpec((L, batch_tile, E), lambda b: (0, b, 0)),   # src (no host xpose)
        full_spec((E, 3 * E)), full_spec((1, 3 * E)),            # fused QKV (q pre-scaled)
        full_spec((E, E)), full_spec((1, E)),                    # out_proj
        full_spec((1, E)), full_spec((1, E)),                    # norm1 gamma/beta
        full_spec((E, F_dim)), full_spec((1, F_dim)),            # linear1
        full_spec((F_dim, E)), full_spec((1, E)),                # linear2
        full_spec((1, E)), full_spec((1, E)),                    # norm2 gamma/beta
    ]

    return pl.pallas_call(
        kernel,
        out_shape=jax.ShapeDtypeStruct((L, N, E), src.dtype),
        grid=(num_tiles,),
        in_specs=in_specs,
        out_specs=pl.BlockSpec((L, batch_tile, E), lambda b: (0, b, 0)),
        compiler_params=pltpu.CompilerParams(
            dimension_semantics=("parallel",)),                  # batch tiles across TCs
    )(src, prep["w_qkv"], prep["b_qkv"], prep["w_out"], prep["b_out"],
      prep["ln1_g"], prep["ln1_b"], prep["w1"], prep["b1"],
      prep["w2"], prep["b2"], prep["ln2_g"], prep["ln2_b"])


# --------------------------------------------------------------------------
# One-time parameter preparation (outside the hot path): transpose weights for
# x @ W, fuse q/k/v, fold the 1/sqrt(head_dim) scale into Wq/bq, pre-cast the
# matmul operands to the MXU compute dtype (bf16 by default), keep biases / LN
# parameters as f32 (1, X) lane rows.
# --------------------------------------------------------------------------
def prepare_params(p, nhead, compute_dtype=jnp.bfloat16):
    E = p["q_w"].shape[0]
    scale = float(E // nhead) ** -0.5
    f32 = jnp.float32
    row = lambda v: v.reshape(1, -1).astype(f32)
    return {
        "w_qkv": jnp.concatenate(
            [p["q_w"].T * scale, p["k_w"].T, p["v_w"].T], axis=1
        ).astype(compute_dtype),
        "b_qkv": jnp.concatenate(
            [p["q_b"] * scale, p["k_b"], p["v_b"]]).reshape(1, -1).astype(f32),
        "w_out": p["out_w"].T.astype(compute_dtype), "b_out": row(p["out_b"]),
        "w1": p["l1_w"].T.astype(compute_dtype), "b1": row(p["l1_b"]),
        "w2": p["l2_w"].T.astype(compute_dtype), "b2": row(p["l2_b"]),
        "ln1_g": row(p["ln1_g"]), "ln1_b": row(p["ln1_b"]),
        "ln2_g": row(p["ln2_g"]), "ln2_b": row(p["ln2_b"]),
    }


# --------------------------------------------------------------------------
# Pure-JAX reference (mirrors the PyTorch module exactly, incl. the [0] quirk)
# --------------------------------------------------------------------------
def _ref_ln(x, g, b, eps=1e-5):
    m = x.mean(-1, keepdims=True)
    v = ((x - m) ** 2).mean(-1, keepdims=True)
    return (x - m) / jnp.sqrt(v + eps) * g + b


def _ref_mha(src, p, nhead):
    L, N, E = src.shape
    hd = E // nhead
    x2 = src.reshape(L * N, E)
    q = x2 @ p["q_w"].T + p["q_b"]
    k = x2 @ p["k_w"].T + p["k_b"]
    v = x2 @ p["v_w"].T + p["v_b"]
    q = q.reshape(L, N * nhead, hd).transpose(1, 0, 2) * (float(hd) ** -0.5)
    k = k.reshape(L, N * nhead, hd).transpose(1, 0, 2)
    v = v.reshape(L, N * nhead, hd).transpose(1, 0, 2)
    s = jnp.einsum("bld,bsd->bls", q, k)
    w = jax.nn.softmax(s, axis=-1)
    o = jnp.einsum("bls,bsd->bld", w, v)
    o = o.transpose(1, 0, 2).reshape(L * N, E) @ p["out_w"].T + p["out_b"]
    return o.reshape(L, N, E)


def _ref_layer(src, p, nhead):
    attn = _ref_mha(src, p, nhead)
    src2 = attn[0]                                   # tensor[0]: first seq position
    x = _ref_ln(src + src2, p["ln1_g"], p["ln1_b"])
    ff = jax.nn.relu(x @ p["l1_w"].T + p["l1_b"]) @ p["l2_w"].T + p["l2_b"]
    return _ref_ln(x + ff, p["ln2_g"], p["ln2_b"])


# --------------------------------------------------------------------------
# Deterministic parameter init (shapes follow the PyTorch module __init__).
# --------------------------------------------------------------------------
def init_params(key, d_model, dim_feedforward):
    E, F = d_model, dim_feedforward
    ks = jax.random.split(key, 12)

    def w(k, shape, s=0.1):
        return (jax.random.normal(k, shape) * s).astype(jnp.float32)

    return {
        "q_w": w(ks[0], (E, E)), "q_b": w(ks[1], (E,)),
        "k_w": w(ks[2], (E, E)), "k_b": w(ks[3], (E,)),
        "v_w": w(ks[4], (E, E)), "v_b": w(ks[5], (E,)),
        "out_w": w(ks[6], (E, E)), "out_b": w(ks[7], (E,)),
        "l1_w": w(ks[8], (F, E)), "l1_b": w(ks[9], (F,)),
        "l2_w": w(ks[10], (E, F)), "l2_b": w(ks[11], (E,)),
        "ln1_g": jnp.ones((E,), jnp.float32), "ln1_b": jnp.zeros((E,), jnp.float32),
        "ln2_g": jnp.ones((E,), jnp.float32), "ln2_b": jnp.zeros((E,), jnp.float32),
    }


if __name__ == "__main__":
    d_model, nhead, dim_feedforward = 32, 4, 64
    L, N = 8, 2   # sequence length, batch

    key = jax.random.PRNGKey(0)
    k_src, k_par = jax.random.split(key)
    src = jax.random.normal(k_src, (L, N, d_model), jnp.float32)
    params = init_params(k_par, d_model, dim_feedforward)
    ref = _ref_layer(src, params, nhead)

    fwd = jax.jit(functools.partial(transformer_encoder_layer, nhead=nhead))

    # Default path: bf16 MXU operands, f32 accumulation & elementwise math.
    out_bf16 = jax.block_until_ready(fwd(src, prepare_params(params, nhead)))
    assert out_bf16.shape == (L, N, d_model)
    err_bf16 = float(jnp.max(jnp.abs(out_bf16 - ref)))
    assert err_bf16 < 5e-2, f"bf16 mismatch vs reference: {err_bf16}"

    # f32 MXU path for a tight correctness check.
    out_f32 = jax.block_until_ready(
        fwd(src, prepare_params(params, nhead, jnp.float32)))
    err_f32 = float(jnp.max(jnp.abs(out_f32 - ref)))
    assert err_f32 < 5e-3, f"f32 mismatch vs reference: {err_f32}"

    print("KERNEL_OK")
</pallas_src>

<mosaic_0001>
module attributes {stable_mosaic.version = 11 : i64} {
  func.func @_encoder_layer_kernel(%arg0: i32, %arg1: memref<8x2x32xf32, #tpu.memory_space<vmem>>, %arg2: memref<32x96xbf16, #tpu.memory_space<vmem>>, %arg3: memref<1x96xf32, #tpu.memory_space<vmem>>, %arg4: memref<32x32xbf16, #tpu.memory_space<vmem>>, %arg5: memref<1x32xf32, #tpu.memory_space<vmem>>, %arg6: memref<1x32xf32, #tpu.memory_space<vmem>>, %arg7: memref<1x32xf32, #tpu.memory_space<vmem>>, %arg8: memref<32x64xbf16, #tpu.memory_space<vmem>>, %arg9: memref<1x64xf32, #tpu.memory_space<vmem>>, %arg10: memref<64x32xbf16, #tpu.memory_space<vmem>>, %arg11: memref<1x32xf32, #tpu.memory_space<vmem>>, %arg12: memref<1x32xf32, #tpu.memory_space<vmem>>, %arg13: memref<1x32xf32, #tpu.memory_space<vmem>>, %arg14: memref<8x2x32xf32, #tpu.memory_space<vmem>>) attributes {dimension_semantics = [#tpu.dimension_semantics<parallel>], iteration_bounds = array<i64: 1>, scalar_prefetch = 0 : i64, scratch_operands = 0 : i64, tpu.core_type = #tpu.core_type<tc>, window_params = [{transform_indices = @transform_0, window_bounds = array<i64: 8, 2, 32>}, {pipeline_mode = #tpu.pipeline_mode<synchronous>, transform_indices = @transform_1, window_bounds = array<i64: 32, 96>}, {pipeline_mode = #tpu.pipeline_mode<synchronous>, transform_indices = @transform_2, window_bounds = array<i64: 1, 96>}, {pipeline_mode = #tpu.pipeline_mode<synchronous>, transform_indices = @transform_3, window_bounds = array<i64: 32, 32>}, {pipeline_mode = #tpu.pipeline_mode<synchronous>, transform_indices = @transform_4, window_bounds = array<i64: 1, 32>}, {pipeline_mode = #tpu.pipeline_mode<synchronous>, transform_indices = @transform_5, window_bounds = array<i64: 1, 32>}, {pipeline_mode = #tpu.pipeline_mode<synchronous>, transform_indices = @transform_6, window_bounds = array<i64: 1, 32>}, {pipeline_mode = #tpu.pipeline_mode<synchronous>, transform_indices = @transform_7, window_bounds = array<i64: 32, 64>}, {pipeline_mode = #tpu.pipeline_mode<synchronous>, transform_indices = @transform_8, window_bounds = array<i64: 1, 64>}, {pipeline_mode = #tpu.pipeline_mode<synchronous>, transform_indices = @transform_9, window_bounds = array<i64: 64, 32>}, {pipeline_mode = #tpu.pipeline_mode<synchronous>, transform_indices = @transform_10, window_bounds = array<i64: 1, 32>}, {pipeline_mode = #tpu.pipeline_mode<synchronous>, transform_indices = @transform_11, window_bounds = array<i64: 1, 32>}, {pipeline_mode = #tpu.pipeline_mode<synchronous>, transform_indices = @transform_12, window_bounds = array<i64: 1, 32>}, {transform_indices = @transform_13, window_bounds = array<i64: 8, 2, 32>}]} {
    %c0 = arith.constant 0 : index
    %c0_0 = arith.constant 0 : index
    %c0_1 = arith.constant 0 : index
    %0 = vector.load %arg1[%c0, %c0_0, %c0_1] : memref<8x2x32xf32, #tpu.memory_space<vmem>>, vector<8x2x32xf32>
    %1 = vector.extract_strided_slice %0 {offsets = [0, 0, 0], sizes = [8, 1, 32], strides = [1, 1, 1]} : vector<8x2x32xf32> to vector<8x1x32xf32>
    %2 = vector.shape_cast %1 : vector<8x1x32xf32> to vector<8x32xf32>
    %3 = vector.extract_strided_slice %0 {offsets = [0, 1, 0], sizes = [8, 1, 32], strides = [1, 1, 1]} : vector<8x2x32xf32> to vector<8x1x32xf32>
    %4 = vector.shape_cast %3 : vector<8x1x32xf32> to vector<8x32xf32>
    %5 = tpu.concatenate %2, %4 in 0 : vector<8x32xf32>, vector<8x32xf32> -> vector<16x32xf32>
    %6 = arith.truncf %5 : vector<16x32xf32> to vector<16x32xbf16>
    %c0_2 = arith.constant 0 : index
    %c0_3 = arith.constant 0 : index
    %7 = vector.load %arg2[%c0_2, %c0_3] : memref<32x96xbf16, #tpu.memory_space<vmem>>, vector<32x96xbf16>
    %cst = arith.constant dense<0.000000e+00> : vector<16x96xf32>
    %8 = tpu.matmul %6, %7, %cst {dimension_numbers = #tpu.dot_dimension_numbers<[1], [0], [0], [1], [0, 0, 1, 1], [], []>} : vector<16x32xbf16>, vector<32x96xbf16>, vector<16x96xf32> -> vector<16x96xf32>
    %c0_4 = arith.constant 0 : index
    %c0_5 = arith.constant 0 : index
    %9 = vector.load %arg3[%c0_4, %c0_5] : memref<1x96xf32, #tpu.memory_space<vmem>>, vector<1x96xf32>
    %10 = vector.broadcast %9 : vector<1x96xf32> to vector<16x96xf32>
    %11 = arith.addf %8, %10 : vector<16x96xf32>
    %12 = vector.extract_strided_slice %11 {offsets = [0, 0], sizes = [8, 8], strides = [1, 1]} : vector<16x96xf32> to vector<8x8xf32>
    %13 = arith.truncf %12 : vector<8x8xf32> to vector<8x8xbf16>
    %14 = vector.extract_strided_slice %11 {offsets = [0, 32], sizes = [8, 8], strides = [1, 1]} : vector<16x96xf32> to vector<8x8xf32>
    %15 = arith.truncf %14 : vector<8x8xf32> to vector<8x8xbf16>
    %16 = vector.extract_strided_slice %11 {offsets = [0, 64], sizes = [8, 8], strides = [1, 1]} : vector<16x96xf32> to vector<8x8xf32>
    %17 = arith.truncf %16 : vector<8x8xf32> to vector<8x8xbf16>
    %cst_6 = arith.constant dense<0.000000e+00> : vector<8x8xf32>
    %18 = tpu.matmul %13, %15, %cst_6 {dimension_numbers = #tpu.dot_dimension_numbers<[1], [1], [0], [0], [0, 0, 1, 0], [], []>} : vector<8x8xbf16>, vector<8x8xbf16>, vector<8x8xf32> -> vector<8x8xf32>
    %cst_7 = arith.constant dense<0xFF800000> : vector<8xf32>
    %19 = vector.multi_reduction <maximumf>, %18, %cst_7 [1] : vector<8x8xf32> to vector<8xf32>
    %20 = vector.shape_cast %19 : vector<8xf32> to vector<8x1xf32>
    %21 = vector.broadcast %20 : vector<8x1xf32> to vector<8x8xf32>
    %22 = arith.subf %18, %21 : vector<8x8xf32>
    %23 = math.exp %22 : vector<8x8xf32>
    %cst_8 = arith.constant dense<0.000000e+00> : vector<8xf32>
    %24 = vector.multi_reduction <add>, %23, %cst_8 [1] : vector<8x8xf32> to vector<8xf32>
    %25 = vector.shape_cast %24 : vector<8xf32> to vector<8x1xf32>
    %26 = tpu.reciprocal %25 {approx = true} : vector<8x1xf32> -> vector<8x1xf32>
    %27 = vector.broadcast %26 : vector<8x1xf32> to vector<8x8xf32>
    %28 = arith.mulf %23, %27 : vector<8x8xf32>
    %29 = arith.truncf %28 : vector<8x8xf32> to vector<8x8xbf16>
    %cst_9 = arith.constant dense<0.000000e+00> : vector<8x8xf32>
    %30 = tpu.matmul %29, %17, %cst_9 {dimension_numbers = #tpu.dot_dimension_numbers<[1], [0], [0], [1], [0, 0, 1, 1], [], []>} : vector<8x8xbf16>, vector<8x8xbf16>, vector<8x8xf32> -> vector<8x8xf32>
    %31 = vector.extract_strided_slice %11 {offsets = [0, 8], sizes = [8, 8], strides = [1, 1]} : vector<16x96xf32> to vector<8x8xf32>
    %32 = arith.truncf %31 : vector<8x8xf32> to vector<8x8xbf16>
    %33 = vector.extract_strided_slice %11 {offsets = [0, 40], sizes = [8, 8], strides = [1, 1]} : vector<16x96xf32> to vector<8x8xf32>
    %34 = arith.truncf %33 : vector<8x8xf32> to vector<8x8xbf16>
    %35 = vector.extract_strided_slice %11 {offsets = [0, 72], sizes = [8, 8], strides = [1, 1]} : vector<16x96xf32> to vector<8x8xf32>
    %36 = arith.truncf %35 : vector<8x8xf32> to vector<8x8xbf16>
    %cst_10 = arith.constant dense<0.000000e+00> : vector<8x8xf32>
    %37 = tpu.matmul %32, %34, %cst_10 {dimension_numbers = #tpu.dot_dimension_numbers<[1], [1], [0], [0], [0, 0, 1, 0], [], []>} : vector<8x8xbf16>, vector<8x8xbf16>, vector<8x8xf32> -> vector<8x8xf32>
    %cst_11 = arith.constant dense<0xFF800000> : vector<8xf32>
    %38 = vector.multi_reduction <maximumf>, %37, %cst_11 [1] : vector<8x8xf32> to vector<8xf32>
    %39 = vector.shape_cast %38 : vector<8xf32> to vector<8x1xf32>
    %40 = vector.broadcast %39 : vector<8x1xf32> to vector<8x8xf32>
    %41 = arith.subf %37, %40 : vector<8x8xf32>
    %42 = math.exp %41 : vector<8x8xf32>
    %cst_12 = arith.constant dense<0.000000e+00> : vector<8xf32>
    %43 = vector.multi_reduction <add>, %42, %cst_12 [1] : vector<8x8xf32> to vector<8xf32>
    %44 = vector.shape_cast %43 : vector<8xf32> to vector<8x1xf32>
    %45 = tpu.reciprocal %44 {approx = true} : vector<8x1xf32> -> vector<8x1xf32>
    %46 = vector.broadcast %45 : vector<8x1xf32> to vector<8x8xf32>
    %47 = arith.mulf %42, %46 : vector<8x8xf32>
    %48 = arith.truncf %47 : vector<8x8xf32> to vector<8x8xbf16>
    %cst_13 = arith.constant dense<0.000000e+00> : vector<8x8xf32>
    %49 = tpu.matmul %48, %36, %cst_13 {dimension_numbers = #tpu.dot_dimension_numbers<[1], [0], [0], [1], [0, 0, 1, 1], [], []>} : vector<8x8xbf16>, vector<8x8xbf16>, vector<8x8xf32> -> vector<8x8xf32>
    %50 = vector.extract_strided_slice %11 {offsets = [0, 16], sizes = [8, 8], strides = [1, 1]} : vector<16x96xf32> to vector<8x8xf32>
    %51 = arith.truncf %50 : vector<8x8xf32> to vector<8x8xbf16>
    %52 = vector.extract_strided_slice %11 {offsets = [0, 48], sizes = [8, 8], strides = [1, 1]} : vector<16x96xf32> to vector<8x8xf32>
    %53 = arith.truncf %52 : vector<8x8xf32> to vector<8x8xbf16>
    %54 = vector.extract_strided_slice %11 {offsets = [0, 80], sizes = [8, 8], strides = [1, 1]} : vector<16x96xf32> to vector<8x8xf32>
    %55 = arith.truncf %54 : vector<8x8xf32> to vector<8x8xbf16>
    %cst_14 = arith.constant dense<0.000000e+00> : vector<8x8xf32>
    %56 = tpu.matmul %51, %53, %cst_14 {dimension_numbers = #tpu.dot_dimension_numbers<[1], [1], [0], [0], [0, 0, 1, 0], [], []>} : vector<8x8xbf16>, vector<8x8xbf16>, vector<8x8xf32> -> vector<8x8xf32>
    %cst_15 = arith.constant dense<0xFF800000> : vector<8xf32>
    %57 = vector.multi_reduction <maximumf>, %56, %cst_15 [1] : vector<8x8xf32> to vector<8xf32>
    %58 = vector.shape_cast %57 : vector<8xf32> to vector<8x1xf32>
    %59 = vector.broadcast %58 : vector<8x1xf32> to vector<8x8xf32>
    %60 = arith.subf %56, %59 : vector<8x8xf32>
    %61 = math.exp %60 : vector<8x8xf32>
    %cst_16 = arith.constant dense<0.000000e+00> : vector<8xf32>
    %62 = vector.multi_reduction <add>, %61, %cst_16 [1] : vector<8x8xf32> to vector<8xf32>
    %63 = vector.shape_cast %62 : vector<8xf32> to vector<8x1xf32>
    %64 = tpu.reciprocal %63 {approx = true} : vector<8x1xf32> -> vector<8x1xf32>
    %65 = vector.broadcast %64 : vector<8x1xf32> to vector<8x8xf32>
    %66 = arith.mulf %61, %65 : vector<8x8xf32>
    %67 = arith.truncf %66 : vector<8x8xf32> to vector<8x8xbf16>
    %cst_17 = arith.constant dense<0.000000e+00> : vector<8x8xf32>
    %68 = tpu.matmul %67, %55, %cst_17 {dimension_numbers = #tpu.dot_dimension_numbers<[1], [0], [0], [1], [0, 0, 1, 1], [], []>} : vector<8x8xbf16>, vector<8x8xbf16>, vector<8x8xf32> -> vector<8x8xf32>
    %69 = vector.extract_strided_slice %11 {offsets = [0, 24], sizes = [8, 8], strides = [1, 1]} : vector<16x96xf32> to vector<8x8xf32>
    %70 = arith.truncf %69 : vector<8x8xf32> to vector<8x8xbf16>
    %71 = vector.extract_strided_slice %11 {offsets = [0, 56], sizes = [8, 8], strides = [1, 1]} : vector<16x96xf32> to vector<8x8xf32>
    %72 = arith.truncf %71 : vector<8x8xf32> to vector<8x8xbf16>
    %73 = vector.extract_strided_slice %11 {offsets = [0, 88], sizes = [8, 8], strides = [1, 1]} : vector<16x96xf32> to vector<8x8xf32>
    %74 = arith.truncf %73 : vector<8x8xf32> to vector<8x8xbf16>
    %cst_18 = arith.constant dense<0.000000e+00> : vector<8x8xf32>
    %75 = tpu.matmul %70, %72, %cst_18 {dimension_numbers = #tpu.dot_dimension_numbers<[1], [1], [0], [0], [0, 0, 1, 0], [], []>} : vector<8x8xbf16>, vector<8x8xbf16>, vector<8x8xf32> -> vector<8x8xf32>
    %cst_19 = arith.constant dense<0xFF800000> : vector<8xf32>
    %76 = vector.multi_reduction <maximumf>, %75, %cst_19 [1] : vector<8x8xf32> to vector<8xf32>
    %77 = vector.shape_cast %76 : vector<8xf32> to vector<8x1xf32>
    %78 = vector.broadcast %77 : vector<8x1xf32> to vector<8x8xf32>
    %79 = arith.subf %75, %78 : vector<8x8xf32>
    %80 = math.exp %79 : vector<8x8xf32>
    %cst_20 = arith.constant dense<0.000000e+00> : vector<8xf32>
    %81 = vector.multi_reduction <add>, %80, %cst_20 [1] : vector<8x8xf32> to vector<8xf32>
    %82 = vector.shape_cast %81 : vector<8xf32> to vector<8x1xf32>
    %83 = tpu.reciprocal %82 {approx = true} : vector<8x1xf32> -> vector<8x1xf32>
    %84 = vector.broadcast %83 : vector<8x1xf32> to vector<8x8xf32>
    %85 = arith.mulf %80, %84 : vector<8x8xf32>
    %86 = arith.truncf %85 : vector<8x8xf32> to vector<8x8xbf16>
    %cst_21 = arith.constant dense<0.000000e+00> : vector<8x8xf32>
    %87 = tpu.matmul %86, %74, %cst_21 {dimension_numbers = #tpu.dot_dimension_numbers<[1], [0], [0], [1], [0, 0, 1, 1], [], []>} : vector<8x8xbf16>, vector<8x8xbf16>, vector<8x8xf32> -> vector<8x8xf32>
    %88 = tpu.concatenate %30, %49, %68, %87 in 1 : vector<8x8xf32>, vector<8x8xf32>, vector<8x8xf32>, vector<8x8xf32> -> vector<8x32xf32>
    %89 = vector.extract_strided_slice %11 {offsets = [8, 0], sizes = [8, 8], strides = [1, 1]} : vector<16x96xf32> to vector<8x8xf32>
    %90 = arith.truncf %89 : vector<8x8xf32> to vector<8x8xbf16>
    %91 = vector.extract_strided_slice %11 {offsets = [8, 32], sizes = [8, 8], strides = [1, 1]} : vector<16x96xf32> to vector<8x8xf32>
    %92 = arith.truncf %91 : vector<8x8xf32> to vector<8x8xbf16>
    %93 = vector.extract_strided_slice %11 {offsets = [8, 64], sizes = [8, 8], strides = [1, 1]} : vector<16x96xf32> to vector<8x8xf32>
    %94 = arith.truncf %93 : vector<8x8xf32> to vector<8x8xbf16>
    %cst_22 = arith.constant dense<0.000000e+00> : vector<8x8xf32>
    %95 = tpu.matmul %90, %92, %cst_22 {dimension_numbers = #tpu.dot_dimension_numbers<[1], [1], [0], [0], [0, 0, 1, 0], [], []>} : vector<8x8xbf16>, vector<8x8xbf16>, vector<8x8xf32> -> vector<8x8xf32>
    %cst_23 = arith.constant dense<0xFF800000> : vector<8xf32>
    %96 = vector.multi_reduction <maximumf>, %95, %cst_23 [1] : vector<8x8xf32> to vector<8xf32>
    %97 = vector.shape_cast %96 : vector<8xf32> to vector<8x1xf32>
    %98 = vector.broadcast %97 : vector<8x1xf32> to vector<8x8xf32>
    %99 = arith.subf %95, %98 : vector<8x8xf32>
    %100 = math.exp %99 : vector<8x8xf32>
    %cst_24 = arith.constant dense<0.000000e+00> : vector<8xf32>
    %101 = vector.multi_reduction <add>, %100, %cst_24 [1] : vector<8x8xf32> to vector<8xf32>
    %102 = vector.shape_cast %101 : vector<8xf32> to vector<8x1xf32>
    %103 = tpu.reciprocal %102 {approx = true} : vector<8x1xf32> -> vector<8x1xf32>
    %104 = vector.broadcast %103 : vector<8x1xf32> to vector<8x8xf32>
    %105 = arith.mulf %100, %104 : vector<8x8xf32>
    %106 = arith.truncf %105 : vector<8x8xf32> to vector<8x8xbf16>
    %cst_25 = arith.constant dense<0.000000e+00> : vector<8x8xf32>
    %107 = tpu.matmul %106, %94, %cst_25 {dimension_numbers = #tpu.dot_dimension_numbers<[1], [0], [0], [1], [0, 0, 1, 1], [], []>} : vector<8x8xbf16>, vector<8x8xbf16>, vector<8x8xf32> -> vector<8x8xf32>
    %108 = vector.extract_strided_slice %11 {offsets = [8, 8], sizes = [8, 8], strides = [1, 1]} : vector<16x96xf32> to vector<8x8xf32>
    %109 = arith.truncf %108 : vector<8x8xf32> to vector<8x8xbf16>
    %110 = vector.extract_strided_slice %11 {offsets = [8, 40], sizes = [8, 8], strides = [1, 1]} : vector<16x96xf32> to vector<8x8xf32>
    %111 = arith.truncf %110 : vector<8x8xf32> to vector<8x8xbf16>
    %112 = vector.extract_strided_slice %11 {offsets = [8, 72], sizes = [8, 8], strides = [1, 1]} : vector<16x96xf32> to vector<8x8xf32>
    %113 = arith.truncf %112 : vector<8x8xf32> to vector<8x8xbf16>
    %cst_26 = arith.constant dense<0.000000e+00> : vector<8x8xf32>
    %114 = tpu.matmul %109, %111, %cst_26 {dimension_numbers = #tpu.dot_dimension_numbers<[1], [1], [0], [0], [0, 0, 1, 0], [], []>} : vector<8x8xbf16>, vector<8x8xbf16>, vector<8x8xf32> -> vector<8x8xf32>
    %cst_27 = arith.constant dense<0xFF800000> : vector<8xf32>
    %115 = vector.multi_reduction <maximumf>, %114, %cst_27 [1] : vector<8x8xf32> to vector<8xf32>
    %116 = vector.shape_cast %115 : vector<8xf32> to vector<8x1xf32>
    %117 = vector.broadcast %116 : vector<8x1xf32> to vector<8x8xf32>
    %118 = arith.subf %114, %117 : vector<8x8xf32>
    %119 = math.exp %118 : vector<8x8xf32>
    %cst_28 = arith.constant dense<0.000000e+00> : vector<8xf32>
    %120 = vector.multi_reduction <add>, %119, %cst_28 [1] : vector<8x8xf32> to vector<8xf32>
    %121 = vector.shape_cast %120 : vector<8xf32> to vector<8x1xf32>
    %122 = tpu.reciprocal %121 {approx = true} : vector<8x1xf32> -> vector<8x1xf32>
    %123 = vector.broadcast %122 : vector<8x1xf32> to vector<8x8xf32>
    %124 = arith.mulf %119, %123 : vector<8x8xf32>
    %125 = arith.truncf %124 : vector<8x8xf32> to vector<8x8xbf16>
    %cst_29 = arith.constant dense<0.000000e+00> : vector<8x8xf32>
    %126 = tpu.matmul %125, %113, %cst_29 {dimension_numbers = #tpu.dot_dimension_numbers<[1], [0], [0], [1], [0, 0, 1, 1], [], []>} : vector<8x8xbf16>, vector<8x8xbf16>, vector<8x8xf32> -> vector<8x8xf32>
    %127 = vector.extract_strided_slice %11 {offsets = [8, 16], sizes = [8, 8], strides = [1, 1]} : vector<16x96xf32> to vector<8x8xf32>
    %128 = arith.truncf %127 : vector<8x8xf32> to vector<8x8xbf16>
    %129 = vector.extract_strided_slice %11 {offsets = [8, 48], sizes = [8, 8], strides = [1, 1]} : vector<16x96xf32> to vector<8x8xf32>
    %130 = arith.truncf %129 : vector<8x8xf32> to vector<8x8xbf16>
    %131 = vector.extract_strided_slice %11 {offsets = [8, 80], sizes = [8, 8], strides = [1, 1]} : vector<16x96xf32> to vector<8x8xf32>
    %132 = arith.truncf %131 : vector<8x8xf32> to vector<8x8xbf16>
    %cst_30 = arith.constant dense<0.000000e+00> : vector<8x8xf32>
    %133 = tpu.matmul %128, %130, %cst_30 {dimension_numbers = #tpu.dot_dimension_numbers<[1], [1], [0], [0], [0, 0, 1, 0], [], []>} : vector<8x8xbf16>, vector<8x8xbf16>, vector<8x8xf32> -> vector<8x8xf32>
    %cst_31 = arith.constant dense<0xFF800000> : vector<8xf32>
    %134 = vector.multi_reduction <maximumf>, %133, %cst_31 [1] : vector<8x8xf32> to vector<8xf32>
    %135 = vector.shape_cast %134 : vector<8xf32> to vector<8x1xf32>
    %136 = vector.broadcast %135 : vector<8x1xf32> to vector<8x8xf32>
    %137 = arith.subf %133, %136 : vector<8x8xf32>
    %138 = math.exp %137 : vector<8x8xf32>
    %cst_32 = arith.constant dense<0.000000e+00> : vector<8xf32>
    %139 = vector.multi_reduction <add>, %138, %cst_32 [1] : vector<8x8xf32> to vector<8xf32>
    %140 = vector.shape_cast %139 : vector<8xf32> to vector<8x1xf32>
    %141 = tpu.reciprocal %140 {approx = true} : vector<8x1xf32> -> vector<8x1xf32>
    %142 = vector.broadcast %141 : vector<8x1xf32> to vector<8x8xf32>
    %143 = arith.mulf %138, %142 : vector<8x8xf32>
    %144 = arith.truncf %143 : vector<8x8xf32> to vector<8x8xbf16>
    %cst_33 = arith.constant dense<0.000000e+00> : vector<8x8xf32>
    %145 = tpu.matmul %144, %132, %cst_33 {dimension_numbers = #tpu.dot_dimension_numbers<[1], [0], [0], [1], [0, 0, 1, 1], [], []>} : vector<8x8xbf16>, vector<8x8xbf16>, vector<8x8xf32> -> vector<8x8xf32>
    %146 = vector.extract_strided_slice %11 {offsets = [8, 24], sizes = [8, 8], strides = [1, 1]} : vector<16x96xf32> to vector<8x8xf32>
    %147 = arith.truncf %146 : vector<8x8xf32> to vector<8x8xbf16>
    %148 = vector.extract_strided_slice %11 {offsets = [8, 56], sizes = [8, 8], strides = [1, 1]} : vector<16x96xf32> to vector<8x8xf32>
    %149 = arith.truncf %148 : vector<8x8xf32> to vector<8x8xbf16>
    %150 = vector.extract_strided_slice %11 {offsets = [8, 88], sizes = [8, 8], strides = [1, 1]} : vector<16x96xf32> to vector<8x8xf32>
    %151 = arith.truncf %150 : vector<8x8xf32> to vector<8x8xbf16>
    %cst_34 = arith.constant dense<0.000000e+00> : vector<8x8xf32>
    %152 = tpu.matmul %147, %149, %cst_34 {dimension_numbers = #tpu.dot_dimension_numbers<[1], [1], [0], [0], [0, 0, 1, 0], [], []>} : vector<8x8xbf16>, vector<8x8xbf16>, vector<8x8xf32> -> vector<8x8xf32>
    %cst_35 = arith.constant dense<0xFF800000> : vector<8xf32>
    %153 = vector.multi_reduction <maximumf>, %152, %cst_35 [1] : vector<8x8xf32> to vector<8xf32>
    %154 = vector.shape_cast %153 : vector<8xf32> to vector<8x1xf32>
    %155 = vector.broadcast %154 : vector<8x1xf32> to vector<8x8xf32>
    %156 = arith.subf %152, %155 : vector<8x8xf32>
    %157 = math.exp %156 : vector<8x8xf32>
    %cst_36 = arith.constant dense<0.000000e+00> : vector<8xf32>
    %158 = vector.multi_reduction <add>, %157, %cst_36 [1] : vector<8x8xf32> to vector<8xf32>
    %159 = vector.shape_cast %158 : vector<8xf32> to vector<8x1xf32>
    %160 = tpu.reciprocal %159 {approx = true} : vector<8x1xf32> -> vector<8x1xf32>
    %161 = vector.broadcast %160 : vector<8x1xf32> to vector<8x8xf32>
    %162 = arith.mulf %157, %161 : vector<8x8xf32>
    %163 = arith.truncf %162 : vector<8x8xf32> to vector<8x8xbf16>
    %cst_37 = arith.constant dense<0.000000e+00> : vector<8x8xf32>
    %164 = tpu.matmul %163, %151, %cst_37 {dimension_numbers = #tpu.dot_dimension_numbers<[1], [0], [0], [1], [0, 0, 1, 1], [], []>} : vector<8x8xbf16>, vector<8x8xbf16>, vector<8x8xf32> -> vector<8x8xf32>
    %165 = tpu.concatenate %107, %126, %145, %164 in 1 : vector<8x8xf32>, vector<8x8xf32>, vector<8x8xf32>, vector<8x8xf32> -> vector<8x32xf32>
    %166 = tpu.concatenate %88, %165 in 0 : vector<8x32xf32>, vector<8x32xf32> -> vector<16x32xf32>
    %167 = arith.truncf %166 : vector<16x32xf32> to vector<16x32xbf16>
    %c0_38 = arith.constant 0 : index
    %c0_39 = arith.constant 0 : index
    %168 = vector.load %arg4[%c0_38, %c0_39] : memref<32x32xbf16, #tpu.memory_space<vmem>>, vector<32x32xbf16>
    %cst_40 = arith.constant dense<0.000000e+00> : vector<16x32xf32>
    %169 = tpu.matmul %167, %168, %cst_40 {dimension_numbers = #tpu.dot_dimension_numbers<[1], [0], [0], [1], [0, 0, 1, 1], [], []>} : vector<16x32xbf16>, vector<32x32xbf16>, vector<16x32xf32> -> vector<16x32xf32>
    %c0_41 = arith.constant 0 : index
    %c0_42 = arith.constant 0 : index
    %170 = vector.load %arg5[%c0_41, %c0_42] : memref<1x32xf32, #tpu.memory_space<vmem>>, vector<1x32xf32>
    %171 = vector.broadcast %170 : vector<1x32xf32> to vector<16x32xf32>
    %172 = arith.addf %169, %171 : vector<16x32xf32>
    %173 = vector.extract_strided_slice %172 {offsets = [0, 0], sizes = [1, 32], strides = [1, 1]} : vector<16x32xf32> to vector<1x32xf32>
    %174 = vector.broadcast %173 : vector<1x32xf32> to vector<8x32xf32>
    %175 = arith.addf %2, %174 : vector<8x32xf32>
    %176 = vector.extract_strided_slice %172 {offsets = [8, 0], sizes = [1, 32], strides = [1, 1]} : vector<16x32xf32> to vector<1x32xf32>
    %177 = vector.broadcast %176 : vector<1x32xf32> to vector<8x32xf32>
    %178 = arith.addf %4, %177 : vector<8x32xf32>
    %179 = tpu.concatenate %175, %178 in 0 : vector<8x32xf32>, vector<8x32xf32> -> vector<16x32xf32>
    %c0_43 = arith.constant 0 : index
    %c0_44 = arith.constant 0 : index
    %180 = vector.load %arg6[%c0_43, %c0_44] : memref<1x32xf32, #tpu.memory_space<vmem>>, vector<1x32xf32>
    %c0_45 = arith.constant 0 : index
    %c0_46 = arith.constant 0 : index
    %181 = vector.load %arg7[%c0_45, %c0_46] : memref<1x32xf32, #tpu.memory_space<vmem>>, vector<1x32xf32>
    %cst_47 = arith.constant dense<0.000000e+00> : vector<16xf32>
    %182 = vector.multi_reduction <add>, %179, %cst_47 [1] : vector<16x32xf32> to vector<16xf32>
    %183 = vector.shape_cast %182 : vector<16xf32> to vector<16x1xf32>
    %cst_48 = arith.constant 3.200000e+01 : f32
    %184 = vector.broadcast %cst_48 : f32 to vector<16x1xf32>
    %185 = arith.divf %183, %184 : vector<16x1xf32>
    %186 = vector.broadcast %185 : vector<16x1xf32> to vector<16x32xf32>
    %187 = arith.subf %179, %186 : vector<16x32xf32>
    %188 = arith.mulf %187, %187 : vector<16x32xf32>
    %cst_49 = arith.constant dense<0.000000e+00> : vector<16xf32>
    %189 = vector.multi_reduction <add>, %188, %cst_49 [1] : vector<16x32xf32> to vector<16xf32>
    %190 = vector.shape_cast %189 : vector<16xf32> to vector<16x1xf32>
    %cst_50 = arith.constant 3.200000e+01 : f32
    %191 = vector.broadcast %cst_50 : f32 to vector<16x1xf32>
    %192 = arith.divf %190, %191 : vector<16x1xf32>
    %cst_51 = arith.constant 9.99999974E-6 : f32
    %193 = vector.broadcast %cst_51 : f32 to vector<16x1xf32>
    %194 = arith.addf %192, %193 : vector<16x1xf32>
    %195 = math.rsqrt %194 : vector<16x1xf32>
    %196 = vector.broadcast %195 : vector<16x1xf32> to vector<16x32xf32>
    %197 = arith.mulf %187, %196 : vector<16x32xf32>
    %198 = vector.broadcast %180 : vector<1x32xf32> to vector<16x32xf32>
    %199 = arith.mulf %197, %198 : vector<16x32xf32>
    %200 = vector.broadcast %181 : vector<1x32xf32> to vector<16x32xf32>
    %201 = arith.addf %199, %200 : vector<16x32xf32>
    %202 = arith.truncf %201 : vector<16x32xf32> to vector<16x32xbf16>
    %c0_52 = arith.constant 0 : index
    %c0_53 = arith.constant 0 : index
    %203 = vector.load %arg8[%c0_52, %c0_53] : memref<32x64xbf16, #tpu.memory_space<vmem>>, vector<32x64xbf16>
    %cst_54 = arith.constant dense<0.000000e+00> : vector<16x64xf32>
    %204 = tpu.matmul %202, %203, %cst_54 {dimension_numbers = #tpu.dot_dimension_numbers<[1], [0], [0], [1], [0, 0, 1, 1], [], []>} : vector<16x32xbf16>, vector<32x64xbf16>, vector<16x64xf32> -> vector<16x64xf32>
    %c0_55 = arith.constant 0 : index
    %c0_56 = arith.constant 0 : index
    %205 = vector.load %arg9[%c0_55, %c0_56] : memref<1x64xf32, #tpu.memory_space<vmem>>, vector<1x64xf32>
    %206 = vector.broadcast %205 : vector<1x64xf32> to vector<16x64xf32>
    %207 = arith.addf %204, %206 : vector<16x64xf32>
    %cst_57 = arith.constant 0.000000e+00 : f32
    %208 = vector.broadcast %cst_57 : f32 to vector<16x64xf32>
    %209 = arith.maximumf %207, %208 : vector<16x64xf32>
    %210 = arith.truncf %209 : vector<16x64xf32> to vector<16x64xbf16>
    %c0_58 = arith.constant 0 : index
    %c0_59 = arith.constant 0 : index
    %211 = vector.load %arg10[%c0_58, %c0_59] : memref<64x32xbf16, #tpu.memory_space<vmem>>, vector<64x32xbf16>
    %cst_60 = arith.constant dense<0.000000e+00> : vector<16x32xf32>
    %212 = tpu.matmul %210, %211, %cst_60 {dimension_numbers = #tpu.dot_dimension_numbers<[1], [0], [0], [1], [0, 0, 1, 1], [], []>} : vector<16x64xbf16>, vector<64x32xbf16>, vector<16x32xf32> -> vector<16x32xf32>
    %c0_61 = arith.constant 0 : index
    %c0_62 = arith.constant 0 : index
    %213 = vector.load %arg11[%c0_61, %c0_62] : memref<1x32xf32, #tpu.memory_space<vmem>>, vector<1x32xf32>
    %214 = vector.broadcast %213 : vector<1x32xf32> to vector<16x32xf32>
    %215 = arith.addf %212, %214 : vector<16x32xf32>
    %216 = arith.addf %201, %215 : vector<16x32xf32>
    %c0_63 = arith.constant 0 : index
    %c0_64 = arith.constant 0 : index
    %217 = vector.load %arg12[%c0_63, %c0_64] : memref<1x32xf32, #tpu.memory_space<vmem>>, vector<1x32xf32>
    %c0_65 = arith.constant 0 : index
    %c0_66 = arith.constant 0 : index
    %218 = vector.load %arg13[%c0_65, %c0_66] : memref<1x32xf32, #tpu.memory_space<vmem>>, vector<1x32xf32>
    %cst_67 = arith.constant dense<0.000000e+00> : vector<16xf32>
    %219 = vector.multi_reduction <add>, %216, %cst_67 [1] : vector<16x32xf32> to vector<16xf32>
    %220 = vector.shape_cast %219 : vector<16xf32> to vector<16x1xf32>
    %cst_68 = arith.constant 3.200000e+01 : f32
    %221 = vector.broadcast %cst_68 : f32 to vector<16x1xf32>
    %222 = arith.divf %220, %221 : vector<16x1xf32>
    %223 = vector.broadcast %222 : vector<16x1xf32> to vector<16x32xf32>
    %224 = arith.subf %216, %223 : vector<16x32xf32>
    %225 = arith.mulf %224, %224 : vector<16x32xf32>
    %cst_69 = arith.constant dense<0.000000e+00> : vector<16xf32>
    %226 = vector.multi_reduction <add>, %225, %cst_69 [1] : vector<16x32xf32> to vector<16xf32>
    %227 = vector.shape_cast %226 : vector<16xf32> to vector<16x1xf32>
    %cst_70 = arith.constant 3.200000e+01 : f32
    %228 = vector.broadcast %cst_70 : f32 to vector<16x1xf32>
    %229 = arith.divf %227, %228 : vector<16x1xf32>
    %cst_71 = arith.constant 9.99999974E-6 : f32
    %230 = vector.broadcast %cst_71 : f32 to vector<16x1xf32>
    %231 = arith.addf %229, %230 : vector<16x1xf32>
    %232 = math.rsqrt %231 : vector<16x1xf32>
    %233 = vector.broadcast %232 : vector<16x1xf32> to vector<16x32xf32>
    %234 = arith.mulf %224, %233 : vector<16x32xf32>
    %235 = vector.broadcast %217 : vector<1x32xf32> to vector<16x32xf32>
    %236 = arith.mulf %234, %235 : vector<16x32xf32>
    %237 = vector.broadcast %218 : vector<1x32xf32> to vector<16x32xf32>
    %238 = arith.addf %236, %237 : vector<16x32xf32>
    %239 = vector.extract_strided_slice %238 {offsets = [0, 0], sizes = [8, 32], strides = [1, 1]} : vector<16x32xf32> to vector<8x32xf32>
    %240 = vector.shape_cast %239 : vector<8x32xf32> to vector<8x1x32xf32>
    %c0_72 = arith.constant 0 : index
    %c0_73 = arith.constant 0 : index
    %c0_74 = arith.constant 0 : index
    %241 = vector.load %arg14[%c0_72, %c0_73, %c0_74] : memref<8x2x32xf32, #tpu.memory_space<vmem>>, vector<8x1x32xf32>
    tpu.vector_store %arg14[%c0_72, %c0_73, %c0_74], %240 {strides = array<i32>} : memref<8x2x32xf32, #tpu.memory_space<vmem>>, vector<8x1x32xf32>,
    %242 = vector.extract_strided_slice %238 {offsets = [8, 0], sizes = [8, 32], strides = [1, 1]} : vector<16x32xf32> to vector<8x32xf32>
    %243 = vector.shape_cast %242 : vector<8x32xf32> to vector<8x1x32xf32>
    %c0_75 = arith.constant 0 : index
    %c1 = arith.constant 1 : index
    %c0_76 = arith.constant 0 : index
    %244 = vector.load %arg14[%c0_75, %c1, %c0_76] : memref<8x2x32xf32, #tpu.memory_space<vmem>>, vector<8x1x32xf32>
    tpu.vector_store %arg14[%c0_75, %c1, %c0_76], %243 {strides = array<i32>} : memref<8x2x32xf32, #tpu.memory_space<vmem>>, vector<8x1x32xf32>,
    return
  }
  func.func @transform_0(%arg0: i32) -> (i32, i32, i32) {
    %c0_i32 = arith.constant 0 : i32
    %c0_i32_0 = arith.constant 0 : i32
    %c0_i32_1 = arith.constant 0 : i32
    return %c0_i32, %arg0, %c0_i32_0 : i32, i32, i32
  }
  func.func @transform_1(%arg0: i32) -> (i32, i32) {
    %c0_i32 = arith.constant 0 : i32
    %c0_i32_0 = arith.constant 0 : i32
    %c0_i32_1 = arith.constant 0 : i32
    return %c0_i32, %c0_i32_0 : i32, i32
  }
  func.func @transform_2(%arg0: i32) -> (i32, i32) {
    %c0_i32 = arith.constant 0 : i32
    %c0_i32_0 = arith.constant 0 : i32
    %c0_i32_1 = arith.constant 0 : i32
    return %c0_i32, %c0_i32_0 : i32, i32
  }
  func.func @transform_3(%arg0: i32) -> (i32, i32) {
    %c0_i32 = arith.constant 0 : i32
    %c0_i32_0 = arith.constant 0 : i32
    %c0_i32_1 = arith.constant 0 : i32
    return %c0_i32, %c0_i32_0 : i32, i32
  }
  func.func @transform_4(%arg0: i32) -> (i32, i32) {
    %c0_i32 = arith.constant 0 : i32
    %c0_i32_0 = arith.constant 0 : i32
    %c0_i32_1 = arith.constant 0 : i32
    return %c0_i32, %c0_i32_0 : i32, i32
  }
  func.func @transform_5(%arg0: i32) -> (i32, i32) {
    %c0_i32 = arith.constant 0 : i32
    %c0_i32_0 = arith.constant 0 : i32
    %c0_i32_1 = arith.constant 0 : i32
    return %c0_i32, %c0_i32_0 : i32, i32
  }
  func.func @transform_6(%arg0: i32) -> (i32, i32) {
    %c0_i32 = arith.constant 0 : i32
    %c0_i32_0 = arith.constant 0 : i32
    %c0_i32_1 = arith.constant 0 : i32
    return %c0_i32, %c0_i32_0 : i32, i32
  }
  func.func @transform_7(%arg0: i32) -> (i32, i32) {
    %c0_i32 = arith.constant 0 : i32
    %c0_i32_0 = arith.constant 0 : i32
    %c0_i32_1 = arith.constant 0 : i32
    return %c0_i32, %c0_i32_0 : i32, i32
  }
  func.func @transform_8(%arg0: i32) -> (i32, i32) {
    %c0_i32 = arith.constant 0 : i32
    %c0_i32_0 = arith.constant 0 : i32
    %c0_i32_1 = arith.constant 0 : i32
    return %c0_i32, %c0_i32_0 : i32, i32
  }
  func.func @transform_9(%arg0: i32) -> (i32, i32) {
    %c0_i32 = arith.constant 0 : i32
    %c0_i32_0 = arith.constant 0 : i32
    %c0_i32_1 = arith.constant 0 : i32
    return %c0_i32, %c0_i32_0 : i32, i32
  }
  func.func @transform_10(%arg0: i32) -> (i32, i32) {
    %c0_i32 = arith.constant 0 : i32
    %c0_i32_0 = arith.constant 0 : i32
    %c0_i32_1 = arith.constant 0 : i32
    return %c0_i32, %c0_i32_0 : i32, i32
  }
  func.func @transform_11(%arg0: i32) -> (i32, i32) {
    %c0_i32 = arith.constant 0 : i32
    %c0_i32_0 = arith.constant 0 : i32
    %c0_i32_1 = arith.constant 0 : i32
    return %c0_i32, %c0_i32_0 : i32, i32
  }
  func.func @transform_12(%arg0: i32) -> (i32, i32) {
    %c0_i32 = arith.constant 0 : i32
    %c0_i32_0 = arith.constant 0 : i32
    %c0_i32_1 = arith.constant 0 : i32
    return %c0_i32, %c0_i32_0 : i32, i32
  }
  func.func @transform_13(%arg0: i32) -> (i32, i32, i32) {
    %c0_i32 = arith.constant 0 : i32
    %c0_i32_0 = arith.constant 0 : i32
    %c0_i32_1 = arith.constant 0 : i32
    return %c0_i32, %arg0, %c0_i32_0 : i32, i32, i32
  }
}

</mosaic_0001>

<bundles_post_ra>
// kernel: transformer_encoder_layer.1
= control target key start
LH: loop header
LB: loop body
LE: loop exit
PB: predicated region body
PF: predicated region fallthrough
CT: control target
= control target key end

     0   :  { %18 = vsyncpa [#allocation3], 0  ;;  %s1706_s0 = inlined_call_operand.vmem [shape: f32[8,2,32], index: 0, kind: input, shape index: {}]   ;;  %s1707_s1 = inlined_call_operand.vmem [shape: bf16[32,96], index: 1, kind: input, shape index: {}]   ;;  %s1708_s2 = inlined_call_operand.vmem [shape: f32[1,96], index: 2, kind: input, shape index: {}]   ;;  %s1709_s3 = inlined_call_operand.vmem [shape: bf16[32,32], index: 3, kind: input, shape index: {}]   ;;  %s1710_s4 = inlined_call_operand.vmem [shape: f32[1,32], index: 4, kind: input, shape index: {}]   ;;  %s1711_s5 = inlined_call_operand.vmem [shape: f32[1,32], index: 5, kind: input, shape index: {}]   ;;  %s1712_s6 = inlined_call_operand.vmem [shape: f32[1,32], index: 6, kind: input, shape index: {}]   ;;  %s1713_s7 = inlined_call_operand.hbm [shape: bf16[32,64], index: 7, kind: input, shape index: {}]   ;;  %s1714_s8 = inlined_call_operand.hbm [shape: f32[1,64], index: 8, kind: input, shape index: {}]   ;;  %s1715_s9 = inlined_call_operand.vmem [shape: bf16[64,32], index: 9, kind: input, shape index: {}]   ;;  %s1716_s10 = inlined_call_operand.hbm [shape: f32[1,32], index: 10, kind: input, shape index: {}]   ;;  %s1717_s11 = inlined_call_operand.vmem [shape: f32[1,32], index: 11, kind: input, shape index: {}]   ;;  %s1718_s12 = inlined_call_operand.vmem [shape: f32[1,32], index: 12, kind: input, shape index: {}]   ;;  %s1719_s13 = inlined_call_operand.hbm [shape: f32[8,2,32], index: 13, kind: output, shape index: {}]  }
   0x1   :  { %19 = vsyncpa [#allocation6], 0  ;;  %s53_s27 = sshll.u32 %s1714_s8, 4  ;;  %s54_s27 = int_to_ptr.hbm [resolvable:$true] %s53_s27 }
   0x2   :  { %20 = vsyncpa [#allocation4], 0  ;;  %s1307_s28 = smov [#allocation5]   ;;  %s39_s15 = sshll.u32 %s1713_s7, 4  ;;  %s40_s15 = int_to_ptr.hbm [resolvable:$true] %s39_s15 }
   0x3   :  { %s55_s29 = sshll.u32 %s1307_s28, 4  ;;  %s1308_s16 = smov [#allocation2]   ;;  %s56_s29 = int_to_ptr.vmem [resolvable:$true] %s55_s29 }
   0x4   :  { %58 = dma.hbm_to_vmem [thread:$0]  %s54_s27, 16, %s56_s29, [#allocation6]  }
   0x5   :  { %s41_s17 = sshll.u32 %s1308_s16, 4  ;;  %s1309_s18 = smov 64   ;;  %s42_s17 = int_to_ptr.vmem [resolvable:$true] %s41_s17 }
   0x6   :  { %s1310_s19 = smov 4   ;;  %s66_s21 = sshll.u32 %s1716_s10, 4  ;;  %s67_s21 = int_to_ptr.hbm [resolvable:$true] %s66_s21 }
   0x7   :  { %47 = dma.hbm_to_vmem [thread:$0]  %s40_s15, 256, %s42_s17, [#allocation3], %s1309_s18, %s1309_s18, %s1310_s19  }
   0x8   :  { %s1311_s22 = smov [#allocation7]  }
   0x9   :  { %s68_s23 = sshll.u32 %s1311_s22, 4  ;;  %s69_s23 = int_to_ptr.vmem [resolvable:$true] %s68_s23 }
   0xa   :  { %71 = dma.hbm_to_vmem [thread:$0]  %s67_s21, 16, %s69_s23, [#allocation6]  }
   0xb   :  { %1301 = dma.done.wait [#allocation3], 256  }
   0xc   :  { %1302 = vsyncadd [#allocation3], 4294967040 }
   0xd   :  { %1303 = dma.done.wait [#allocation6], 32  }
   0xe   :  { %1304 = vsyncadd [#allocation6], 4294967264  ;;  %vm106_vm0 = vcmask 1041409   ;;  %vm109_vm1 = vcmask 1042434   ;;  %vm112_vm2 = vcmask 1043459   ;;  %vm115_vm3 = vcmask 1044484  }
   0xf   :  { %v1109_v0 = vld [vmem:[%s1707_s1 + $0x8] sm:$0xff]  ;;  %v1108_v1 = vld [vmem:[%s1707_s1] sm:$0xff]  ;;  %vm118_vm4 = vcmask 1045509   ;;  %vm121_vm5 = vcmask 1046534   ;;  %vm124_vm6 = vcmask 1047559   ;;  %vm163_vm7 = vcmask 261120  }
  0x10   :  { %v1419_v2 = vld [vmem:[%s1706_s0] sm:$0x3]  ;;  %v1424_v3 = vld [vmem:[%s1706_s0 + $0x2] sm:$0x3]  ;;  %v1429_v4 = vld [vmem:[%s1706_s0 + $0x4] sm:$0x3]  ;;  %173 = vmatpush.bf16.msra.mxu0 %v1109_v0 }
  0x11   :  { %v1434_v5 = vld [vmem:[%s1706_s0 + $0x6] sm:$0x3]  ;;  %v1439_v6 = vld [vmem:[%s1706_s0 + $0x8] sm:$0x3]  ;;  %v1444_v7 = vld [vmem:[%s1706_s0 + $0xa] sm:$0x3] }
  0x12   :  { %v1449_v8 = vld [vmem:[%s1706_s0 + $0xc] sm:$0x3]  ;;  %v1454_v9 = vld [vmem:[%s1706_s0 + $0xe] sm:$0x3]  ;;  %v105_v10 = vrot.slane %v1424_v3, 7  ;;  %v108_v11 = vrot.slane %v1429_v4, 6 }
  0x13   :  { %v111_v12 = vrot.slane %v1434_v5, 5  ;;  %v114_v13 = vrot.slane %v1439_v6, 4  ;;  %v117_v14 = vrot.slane %v1444_v7, 3  ;;  %v120_v15 = vrot.slane %v1449_v8, 2  ;;  %v1155_v39 = vld [vmem:[%s1708_s2] ss:$0 sm:$0xff] }
  0x14   :  { %v127_v16 = vrot.slane %v1419_v2, 1  ;;  %v107_v17 = vsel %vm106_vm0, %v105_v10, %v1419_v2  ;;  %v129_v18 = vrot.slane %v1429_v4, 7  ;;  %v131_v19 = vrot.slane %v1434_v5, 6  ;;  %174 = vmatpush.bf16.msra.mxu0 %v1108_v1  ;;  %s1312_s24 = smov 104   ;;  %s1313_s25 = smov 120  }
  0x15   :  { %v133_v20 = vrot.slane %v1439_v6, 5  ;;  %v110_v21 = vsel %vm109_vm1, %v108_v11, %v107_v17  ;;  %v123_v22 = vrot.slane %v1454_v9, 1  ;;  %v135_v24 = vrot.slane %v1444_v7, 4  ;;  %s1314_s26 = smov 96   ;;  %s1315_s10 = smov 80  }
  0x16   :  { %v128_v23 = vsel %vm106_vm0, %v1424_v3, %v127_v16  ;;  %v113_v25 = vsel %vm112_vm2, %v111_v12, %v110_v21  ;;  %v137_v27 = vrot.slane %v1449_v8, 3  ;;  %v139_v28 = vrot.slane %v1454_v9, 2  ;;  %s1316_s27 = smov 72   ;;  %s1317_s2 = smov 88  }
  0x17   :  { %v130_v26 = vsel %vm109_vm1, %v129_v18, %v128_v23  ;;  %v116_v29 = vsel %vm115_vm3, %v114_v13, %v113_v25  ;;  %s1318_s28 = smov 112   ;;  %s1319_s29 = smov 56   ;;  %vm185_vm8 = vcmask 64512   ;;  %vm222_vm9 = vcmask 1043456  }
  0x18   :  { %v132_v30 = vsel %vm112_vm2, %v131_v19, %v130_v26  ;;  %v119_v31 = vsel %vm118_vm4, %v117_v14, %v116_v29  ;;  %s1320_s30 = smov 48   ;;  %s1321_s14 = smov 40   ;;  %vm420_vm10 = vcmask 130048   ;;  %vm422_vm11 = vcmask 195584  }
  0x19   :  { %v134_v32 = vsel %vm115_vm3, %v133_v20, %v132_v30  ;;  %v122_v33 = vsel %vm121_vm5, %v120_v15, %v119_v31  ;;  %s1323_s15 = smov 16   ;;  %s1324_s16 = smov 24  }
  0x1a   :  { %v136_v34 = vsel %vm118_vm4, %v135_v24, %v134_v32  ;;  %v125_v35 = vsel %vm124_vm6, %v123_v22, %v122_v33 }
  0x1b   :  { %v138_v36 = vsel %vm121_vm5, %v137_v27, %v136_v34 }
  0x1c   :  { %v140_v37 = vsel %vm124_vm6, %v139_v28, %v138_v36 }
  0x1d   :  { %v142_v38 = vpack.c.bf16 %v140_v37, %v125_v35 }
  0x1f   :  { %1056 = vmatmul.msk.bf16.vlgmr.msra.gmra.mxu0 %vm163_vm7, %v142_v38 }
  0x9c   :  { %v176_v40 = vpop.f32.mrf.mxu0 }
  0x9d   :  { %v177_v41 = vadd.f32 %v1155_v39, %v176_v40 }
  0x9f   :  { %v1490_v42 = vpack.c.bf16 %v177_v41, %v177_v41 }
  0xa1   :  { %351 = vrot.lane.b32.xlu2 %v1490_v42, %s1312_s24  ;;  %239 = vrot.lane.b32.xlu1 %v1490_v42, %s1313_s25 }
  0xa2   :  { %183 = vrot.lane.b32.xlu0 %v1490_v42, %s1314_s26 }
  0xa4   :  { %v178_v43 = vpop.f32.mrf.mxu0 }
  0xa5   :  { %v179_v44 = vadd.f32 %v1155_v39, %v178_v43 }
  0xa7   :  { %v1498_v45 = vpack.c.bf16 %v179_v44, %v179_v44 }
  0xa9   :  { %297 = vrot.lane.b32.xlu2 %v1490_v42, %s1315_s10  ;;  %353 = vrot.lane.b32.xlu1 %v1490_v42, %s1316_s27 }
  0xaa   :  { %241 = vrot.lane.b32.xlu0 %v1490_v42, %s1317_s2 }
  0xb1   :  { %480 = vrot.lane.b32.xlu2 %v1498_v45, %s1313_s25  ;;  %295 = vrot.lane.b32.xlu1 %v1490_v42, %s1318_s28 }
  0xb2   :  { %482 = vrot.lane.b32.xlu0 %v1498_v45, %s1317_s2 }
  0xb9   :  { %592 = vrot.lane.b32.xlu2 %v1498_v45, %s1312_s24  ;;  %594 = vrot.lane.b32.xlu1 %v1498_v45, %s1316_s27 }
  0xba   :  { %426 = vrot.lane.b32.xlu0 %v1498_v45, %s1314_s26 }
  0xc1   :  { %536 = vrot.lane.b32.xlu1 %v1498_v45, %s1318_s28 }
  0xc2   :  { %538 = vrot.lane.b32.xlu0 %v1498_v45, %s1315_s10 }
  0xc9   :  { %274 = vrot.lane.b32.xlu1 %v1490_v42, %s1319_s29 }
  0xfb   :  { %v352_v46 = vpop.permute.xlu2 %351 }
 0x103   :  { %v298_v47 = vpop.permute.xlu2 %297 }
 0x104   :  { %v303_v48 = vsel %vm185_vm8, %v298_v47, 0 }
 0x105   :  { %312 = vmatpush.bf16.xpose.msrb.mxu0 %v303_v48 }
 0x10b   :  { %v481_v1 = vpop.permute.xlu2 %480 }
 0x113   :  { %v240_v49 = vpop.permute.xlu1 %239  ;;  %v593_v11 = vpop.permute.xlu2 %592 }
 0x114   :  { %v184_v50 = vpop.permute.xlu0 %183 }
 0x115   :  { %v190_v51 = vsel %vm185_vm8, %v184_v50, 0 }
 0x116   :  { %199 = vmatpush.bf16.xpose.msra.mxu1 %v190_v51 }
 0x11b   :  { %v354_v52 = vpop.permute.xlu1 %353 }
 0x11c   :  { %v242_v53 = vpop.permute.xlu0 %241  ;;  %v359_v54 = vsel %vm185_vm8, %v354_v52, 0 }
 0x11d   :  { %1057 = vmatmul.msk.bf16.vlgmr.msra.gmra.mxu1 %vm185_vm8, %v1490_v42  ;;  %v247_v55 = vsel %vm185_vm8, %v242_v53, 0 }
 0x11e   :  { %256 = vmatpush.bf16.xpose.msra.mxu3 %v247_v55 }
 0x123   :  { %v296_v56 = vpop.permute.xlu1 %295 }
 0x124   :  { %v483_v57 = vpop.permute.xlu0 %482  ;;  %1061 = vmatmul.msk.bf16.vlgmr.msrb.gmra.mxu0 %vm185_vm8, %v296_v56 }
 0x125   :  { %v488_v58 = vsel %vm185_vm8, %v483_v57, 0  ;;  %1059 = vmatmul.msk.bf16.vlgmr.msra.gmra.mxu3 %vm185_vm8, %v240_v49 }
 0x126   :  { %368 = vmatpush.bf16.xpose.msrb.mxu3 %v359_v54 }
 0x12b   :  { %v595_v61 = vpop.permute.xlu1 %594 }
 0x12c   :  { %v427_v59 = vpop.permute.xlu0 %426  ;;  %v600_v63 = vsel %vm185_vm8, %v595_v61, 0 }
 0x12d   :  { %v432_v60 = vsel %vm185_vm8, %v427_v59, 0 }
 0x12e   :  { %497 = vmatpush.bf16.xpose.msra.mxu3 %v488_v58  ;;  %441 = vmatpush.bf16.xpose.msra.mxu0 %v432_v60 }
 0x133   :  { %v537_v10 = vpop.permute.xlu1 %536 }
 0x134   :  { %v539_v62 = vpop.permute.xlu0 %538 }
 0x135   :  { %v544_v0 = vsel %vm185_vm8, %v539_v62, 0  ;;  %1063 = vmatmul.msk.bf16.vlgmr.msrb.gmra.mxu3 %vm185_vm8, %v352_v46  ;;  %1065 = vmatmul.msk.bf16.vlgmr.msra.gmra.mxu0 %vm185_vm8, %v1498_v45 }
 0x136   :  { %609 = vmatpush.bf16.xpose.msrb.mxu3 %v600_v63  ;;  %553 = vmatpush.bf16.xpose.msrb.mxu0 %v544_v0 }
 0x13b   :  { %v275_v47 = vpop.permute.xlu1 %274 }
 0x13c   :  { %v280_v52 = vsel %vm222_vm9, %v275_v47, 0 }
 0x145   :  { %1067 = vmatmul.msk.bf16.vlgmr.msra.gmra.mxu3 %vm185_vm8, %v481_v1  ;;  %1069 = vmatmul.msk.bf16.vlgmr.msrb.gmra.mxu0 %vm185_vm8, %v537_v10 }
 0x155   :  { %1071 = vmatmul.msk.bf16.vlgmr.msrb.gmra.mxu3 %vm185_vm8, %v593_v11 }
 0x19a   :  { %v201_v12 = vpop.f32.mrf.mxu1 }
 0x19b   :  { %v205_v13 = vsel %vm185_vm8, %v201_v12, -inf }
 0x19c   :  { %206 = vmax.xlane.f32.xlu2 %v205_v13 }
 0x1a1   :  { %v314_v14 = vpop.f32.mrf.mxu0 }
 0x1a2   :  { %v203_v15 = vpop.f32.mrf.mxu1  ;;  %v318_v16 = vsel %vm185_vm8, %v314_v14, -inf }
 0x1a4   :  { %319 = vmax.xlane.f32.xlu2 %v318_v16 }
 0x1a8   :  { %v258_v17 = vpop.f32.mrf.mxu3 }
 0x1a9   :  { %v316_v18 = vpop.f32.mrf.mxu0  ;;  %v262_v19 = vsel %vm185_vm8, %v258_v17, -inf }
 0x1aa   :  { %263 = vmax.xlane.f32.xlu0 %v262_v19 }
 0x1b0   :  { %v260_v20 = vpop.f32.mrf.mxu3 }
 0x1b2   :  { %v443_v21 = vpop.f32.mrf.mxu0 }
 0x1b3   :  { %v447_v22 = vsel %vm185_vm8, %v443_v21, -inf }
 0x1b4   :  { %448 = vmax.xlane.f32.xlu1 %v447_v22 }
 0x1b8   :  { %v1532_v23 = vpop.f32.mrf.mxu3 }
 0x1b9   :  { %v374_v25 = vsel %vm185_vm8, %v1532_v23, -inf }
 0x1ba   :  { %v445_v24 = vpop.f32.mrf.mxu0 }
 0x1bc   :  { %217 = vrot.lane.b32.xlu2 %v1490_v42, %s1309_s18  ;;  %375 = vmax.xlane.f32.xlu1 %v374_v25 }
 0x1c0   :  { %v372_v26 = vpop.f32.mrf.mxu3 }
 0x1c2   :  { %v555_v27 = vpop.f32.mrf.mxu0 }
 0x1c3   :  { %v559_v28 = vsel %vm185_vm8, %v555_v27, -inf }
 0x1c4   :  { %560 = vmax.xlane.f32.xlu0 %v559_v28 }
 0x1c8   :  { %v1539_v29 = vpop.f32.mrf.mxu3 }
 0x1c9   :  { %v503_v35 = vsel %vm185_vm8, %v1539_v29, -inf }
 0x1ca   :  { %v557_v30 = vpop.f32.mrf.mxu0 }
 0x1d0   :  { %v501_v31 = vpop.f32.mrf.mxu3 }
 0x1d5   :  { %330 = vrot.lane.b32.xlu1 %v1490_v42, %s1320_s30 }
 0x1d8   :  { %v611_v32 = vpop.f32.mrf.mxu3 }
 0x1d9   :  { %v615_v33 = vsel %vm185_vm8, %v611_v32, -inf }
 0x1da   :  { %616 = vmax.xlane.f32.xlu0 %v615_v33 }
 0x1e0   :  { %v613_v34 = vpop.f32.mrf.mxu3 }
 0x1e5   :  { %504 = vmax.xlane.f32.xlu2 %v503_v35 }
 0x20f   :  { %v207_v36 = vpop.xlane.xlu2 %206 }
 0x210   :  { %v208_v37 = vsub.f32 %v201_v12, %v207_v36 }
 0x212   :  { %v209_v38 = vmul.f32 1.442695, %v208_v37 }
 0x214   :  { %1163 = vpow2.f32 %v209_v38 }
 0x217   :  { %v320_v39 = vpop.xlane.xlu2 %319 }
 0x218   :  { %v321_v40 = vsub.f32 %v314_v14, %v320_v39 }
 0x21a   :  { %v1546_v41 = vpop.eup %1163  ;;  %v322_v43 = vmul.f32 1.442695, %v321_v40 }
 0x21b   :  { %v211_v44 = vsel %vm185_vm8, %v1546_v41, 0.0 }
 0x21c   :  { %1165 = vpow2.f32 %v322_v43  ;;  %212 = vadd.xlane.f32.xlu0 %v211_v44 }
 0x21d   :  { %v264_v46 = vpop.xlane.xlu0 %263 }
 0x21e   :  { %v265_v48 = vsub.f32 %v258_v17, %v264_v46 }
 0x21f   :  { %v218_v49 = vpop.permute.xlu2 %217 }
 0x220   :  { %v266_v50 = vmul.f32 1.442695, %v265_v48  ;;  %v224_v51 = vsel %vm222_vm9, %v218_v49, 0 }
 0x221   :  { %233 = vmatpush.bf16.msra.mxu2 %v224_v51 }
 0x222   :  { %v1552_v53 = vpop.eup %1165  ;;  %1167 = vpow2.f32 %v266_v50 }
 0x223   :  { %v324_v54 = vsel %vm185_vm8, %v1552_v53, 0.0 }
 0x224   :  { %325 = vadd.xlane.f32.xlu2 %v324_v54 }
 0x225   :  { %289 = vmatpush.bf16.msrb.mxu2 %v280_v52 }
 0x227   :  { %v449_v57 = vpop.xlane.xlu1 %448 }
 0x228   :  { %v1556_v55 = vpop.eup %1167  ;;  %v450_v60 = vsub.f32 %v443_v21, %v449_v57 }
 0x229   :  { %v268_v56 = vsel %vm185_vm8, %v1556_v55, 0.0 }
 0x22a   :  { %269 = vadd.xlane.f32.xlu1 %v268_v56  ;;  %v451_v62 = vmul.f32 1.442695, %v450_v60 }
 0x22c   :  { %1169 = vpow2.f32 %v451_v62 }
 0x22f   :  { %v376_v58 = vpop.xlane.xlu1 %375 }
 0x230   :  { %386 = vrot.lane.b32.xlu0 %v1490_v42, %s1321_s14  ;;  %v377_v0 = vsub.f32 %v1532_v23, %v376_v58 }
 0x232   :  { %v378_v42 = vmul.f32 1.442695, %v377_v0  ;;  %v1170_v11 = vpop.eup %1169 }
 0x233   :  { %v453_v15 = vsel %vm185_vm8, %v1170_v11, 0.0 }
 0x234   :  { %1171 = vpow2.f32 %v378_v42 }
 0x237   :  { %v561_v63 = vpop.xlane.xlu0 %560 }
 0x238   :  { %v562_v1 = vsub.f32 %v555_v27, %v561_v63 }
 0x23a   :  { %v563_v12 = vmul.f32 1.442695, %v562_v1  ;;  %v1172_v18 = vpop.eup %1171 }
 0x23b   :  { %v380_v21 = vsel %vm185_vm8, %v1172_v18, 0.0 }
 0x23c   :  { %515 = vrot.lane.b32.xlu2 %v1498_v45, %s1319_s29  ;;  %1173 = vpow2.f32 %v563_v12 }
 0x242   :  { %v1570_v20 = vpop.eup %1173 }
 0x243   :  { %459 = vrot.lane.b32.xlu1 %v1498_v45, %s1309_s18  ;;  %v565_v22 = vsel %vm185_vm8, %v1570_v20, 0.0  ;;  %s1322_s18 = smov 8  }
 0x247   :  { %v331_v59 = vpop.permute.xlu1 %330 }
 0x248   :  { %v336_v61 = vsel %vm222_vm9, %v331_v59, 0 }
 0x249   :  { %345 = vmatpush.bf16.msrb.mxu1 %v336_v61 }
 0x24d   :  { %v617_v10 = vpop.xlane.xlu0 %616 }
 0x24e   :  { %v618_v13 = vsub.f32 %v611_v32, %v617_v10 }
 0x250   :  { %v619_v17 = vmul.f32 1.442695, %v618_v13 }
 0x252   :  { %1175 = vpow2.f32 %v619_v17 }
 0x258   :  { %v505_v14 = vpop.xlane.xlu2 %504  ;;  %v1575_v23 = vpop.eup %1175 }
 0x259   :  { %v506_v16 = vsub.f32 %v1539_v29, %v505_v14  ;;  %v621_v25 = vsel %vm185_vm8, %v1575_v23, 0.0 }
 0x25a   :  { %454 = vadd.xlane.f32.xlu0 %v453_v15 }
 0x25b   :  { %v507_v19 = vmul.f32 1.442695, %v506_v16 }
 0x25d   :  { %1177 = vpow2.f32 %v507_v19 }
 0x262   :  { %381 = vadd.xlane.f32.xlu0 %v380_v21 }
 0x263   :  { %v1178_v24 = vpop.eup %1177 }
 0x264   :  { %v509_v26 = vsel %vm185_vm8, %v1178_v24, 0.0 }
 0x265   :  { %566 = vadd.xlane.f32.xlu2 %v565_v22 }
 0x26a   :  { %622 = vadd.xlane.f32.xlu0 %v621_v25 }
 0x26d   :  { %510 = vadd.xlane.f32.xlu1 %v509_v26 }
 0x27e   :  { %627 = vrot.lane.b32.xlu0 %v1498_v45, %s1321_s14  ;;  %s1034_s14 = sshll.u32 %s1719_s13, 4  ;;  %s1035_s14 = int_to_ptr.hbm [resolvable:$true] %s1034_s14 }
 0x286   :  { %571 = vrot.lane.b32.xlu1 %v1498_v45, %s1320_s30 }
 0x28f   :  { %v213_v27 = vpop.xlane.xlu0 %212 }
 0x290   :  { %1179 = vrcp.f32 %v213_v27 }
 0x296   :  { %v1180_v28 = vpop.eup %1179 }
 0x297   :  { %v326_v29 = vpop.xlane.xlu2 %325  ;;  %v215_v30 = vmul.f32 %v1180_v28, %v1546_v41 }
 0x298   :  { %1181 = vrcp.f32 %v326_v29 }
 0x299   :  { %v216_v31 = vpack.c.bf16 %v215_v30, %v215_v30 }
 0x29b   :  { %1058 = vmatmul.msk.bf16.vlgmr.msra.gmra.mxu2 %vm185_vm8, %v216_v31 }
 0x29d   :  { %v270_v32 = vpop.xlane.xlu1 %269 }
 0x29e   :  { %v1182_v33 = vpop.eup %1181  ;;  %1183 = vrcp.f32 %v270_v32  ;;  %v1111_v32 = vld [vmem:[%s1709_s3 + $0x8] sm:$0xff] }
 0x29f   :  { %v328_v34 = vmul.f32 %v1182_v33, %v1552_v53  ;;  %v516_v39 = vpop.permute.xlu2 %515  ;;  %693 = vmatpush.bf16.msra.mxu0 %v1111_v32  ;;  %v1110_v33 = vld [vmem:[%s1709_s3] sm:$0xff] }
 0x2a0   :  { %v521_v41 = vsel %vm222_vm9, %v516_v39, 0 }
 0x2a1   :  { %v329_v35 = vpack.c.bf16 %v328_v34, %v328_v34 }
 0x2a2   :  { %v387_v36 = vpop.permute.xlu0 %386 }
 0x2a3   :  { %v392_v37 = vsel %vm222_vm9, %v387_v36, 0  ;;  %1062 = vmatmul.msk.bf16.vlgmr.msrb.gmra.mxu1 %vm185_vm8, %v329_v35  ;;  %694 = vmatpush.bf16.msra.mxu0 %v1110_v33 }
 0x2a4   :  { %v1184_v45 = vpop.eup %1183  ;;  %401 = vmatpush.bf16.msra.mxu2 %v392_v37 }
 0x2a5   :  { %v272_v38 = vmul.f32 %v1184_v45, %v1556_v55 }
 0x2a7   :  { %v273_v40 = vpack.c.bf16 %v272_v38, %v272_v38 }
 0x2ab   :  { %1060 = vmatmul.msk.bf16.vlgmr.msrb.gmra.mxu2 %vm185_vm8, %v273_v40 }
 0x2ac   :  { %530 = vmatpush.bf16.msrb.mxu2 %v521_v41 }
 0x2b5   :  { %v460_v43 = vpop.permute.xlu1 %459 }
 0x2b6   :  { %v465_v44 = vsel %vm222_vm9, %v460_v43, 0 }
 0x2b7   :  { %474 = vmatpush.bf16.msra.mxu1 %v465_v44 }
 0x2cd   :  { %v455_v46 = vpop.xlane.xlu0 %454 }
 0x2ce   :  { %1185 = vrcp.f32 %v455_v46 }
 0x2d4   :  { %v1186_v47 = vpop.eup %1185 }
 0x2d5   :  { %v457_v48 = vmul.f32 %v1186_v47, %v1170_v11  ;;  %v382_v49 = vpop.xlane.xlu0 %381 }
 0x2d6   :  { %1187 = vrcp.f32 %v382_v49 }
 0x2d7   :  { %v458_v50 = vpack.c.bf16 %v457_v48, %v457_v48 }
 0x2d8   :  { %v567_v57 = vpop.xlane.xlu2 %566 }
 0x2d9   :  { %1066 = vmatmul.msk.bf16.vlgmr.msra.gmra.mxu1 %vm185_vm8, %v458_v50 }
 0x2dc   :  { %v1188_v51 = vpop.eup %1187 }
 0x2dd   :  { %v384_v52 = vmul.f32 %v1188_v51, %v1172_v18  ;;  %v623_v56 = vpop.xlane.xlu0 %622  ;;  %v1156_v51 = vld [vmem:[%s1710_s4] ss:$0 sm:$0xff] }
 0x2df   :  { %v385_v53 = vpack.c.bf16 %v384_v52, %v384_v52 }
 0x2e0   :  { %v511_v54 = vpop.xlane.xlu1 %510 }
 0x2e1   :  { %1064 = vmatmul.msk.bf16.vlgmr.msra.gmra.mxu2 %vm185_vm8, %v385_v53  ;;  %1189 = vrcp.f32 %v511_v54 }
 0x2e2   :  { %1191 = vrcp.f32 %v567_v57 }
 0x2e3   :  { %1193 = vrcp.f32 %v623_v56 }
 0x2e7   :  { %v1190_v55 = vpop.eup %1189 }
 0x2e8   :  { %v513_v58 = vmul.f32 %v1190_v55, %v1178_v24  ;;  %v1192_v62 = vpop.eup %1191 }
 0x2e9   :  { %v569_v63 = vmul.f32 %v1192_v62, %v1570_v20  ;;  %v1194_v0 = vpop.eup %1193 }
 0x2ea   :  { %v514_v59 = vpack.c.bf16 %v513_v58, %v513_v58  ;;  %v625_v11 = vmul.f32 %v1194_v0, %v1575_v23 }
 0x2eb   :  { %v570_v10 = vpack.c.bf16 %v569_v63, %v569_v63 }
 0x2ec   :  { %v626_v12 = vpack.c.bf16 %v625_v11, %v625_v11 }
 0x2f0   :  { %v628_v60 = vpop.permute.xlu0 %627 }
 0x2f1   :  { %v633_v61 = vsel %vm222_vm9, %v628_v60, 0  ;;  %1068 = vmatmul.msk.bf16.vlgmr.msrb.gmra.mxu2 %vm185_vm8, %v514_v59 }
 0x2f2   :  { %642 = vmatpush.bf16.msra.mxu2 %v633_v61 }
 0x2f8   :  { %v572_v1 = vpop.permute.xlu1 %571 }
 0x2f9   :  { %v577_v42 = vsel %vm222_vm9, %v572_v1, 0 }
 0x2fa   :  { %586 = vmatpush.bf16.msrb.mxu1 %v577_v42 }
 0x2fd   :  { %1070 = vmatmul.msk.bf16.vlgmr.msrb.gmra.mxu1 %vm185_vm8, %v570_v10 }
 0x301   :  { %1072 = vmatmul.msk.bf16.vlgmr.msra.gmra.mxu2 %vm185_vm8, %v626_v12 }
 0x31e   :  { %v235_v13 = vpop.f32.mrf.mxu2 }
 0x320   :  { %v347_v14 = vpop.f32.mrf.mxu1 }
 0x326   :  { %v237_v15 = vpop.f32.mrf.mxu2 }
 0x328   :  { %v349_v16 = vpop.f32.mrf.mxu1 }
 0x32e   :  { %v291_v17 = vpop.f32.mrf.mxu2 }
 0x336   :  { %v293_v18 = vpop.f32.mrf.mxu2 }
 0x356   :  { %v476_v19 = vpop.f32.mrf.mxu1 }
 0x35e   :  { %v478_v20 = vpop.f32.mrf.mxu1 }
 0x364   :  { %v403_v21 = vpop.f32.mrf.mxu2 }
 0x36c   :  { %v405_v22 = vpop.f32.mrf.mxu2 }
 0x374   :  { %v532_v24 = vpop.f32.mrf.mxu2 }
 0x375   :  { %v1145_v25 = vpack.i.bf16 %v532_v24, %v291_v17 }
 0x377   :  { %1146 = vrot.lane.b32.xlu0 %v1145_v25, %s1322_s18  ;;  %s1327_s18 = smov 32  }
 0x37a   :  { %v588_v23 = vpop.f32.mrf.mxu1 }
 0x37b   :  { %v1140_v26 = vpack.i.bf16 %v588_v23, %v347_v14 }
 0x37c   :  { %v534_v27 = vpop.f32.mrf.mxu2 }
 0x37d   :  { %1141 = vrot.lane.b32.xlu1 %v1140_v26, %s1323_s15  ;;  %s1328_s15 = smov 2  }
 0x382   :  { %v590_v28 = vpop.f32.mrf.mxu1 }
 0x384   :  { %v644_v29 = vpop.f32.mrf.mxu2 }
 0x385   :  { %v1150_v30 = vpack.i.bf16 %v644_v29, %v403_v21 }
 0x387   :  { %1151 = vrot.lane.b32.xlu0 %v1150_v30, %s1324_s16 }
 0x38c   :  { %v646_v31 = vpop.f32.mrf.mxu2 }
 0x3e9   :  { %v1147_v34 = vpop.permute.xlu0 %1146 }
 0x3ea   :  { %v1149_v36 = vunpack.i.h.bf16 %v1147_v34  ;;  %v1148_v37 = vunpack.i.l.bf16 %v1147_v34 }
 0x3ec   :  { %v660_v40 = vsel %vm185_vm8, %v476_v19, %v1149_v36  ;;  %v419_v41 = vsel %vm185_vm8, %v235_v13, %v1148_v37 }
 0x3ef   :  { %v1142_v35 = vpop.permute.xlu1 %1141 }
 0x3f0   :  { %v1144_v45 = vunpack.i.h.bf16 %v1142_v35  ;;  %v1143_v38 = vunpack.i.l.bf16 %v1142_v35 }
 0x3f2   :  { %v421_v46 = vsel %vm420_vm10, %v419_v41, %v1143_v38  ;;  %v661_v47 = vsel %vm420_vm10, %v660_v40, %v1144_v45  ;;  %v1325_v38 = vmov 32.0  }
 0x3f3   :  { %1195 = vrcp.f32 %v1325_v38 }
 0x3f9   :  { %v1152_v39 = vpop.permute.xlu0 %1151 }
 0x3fa   :  { %v1154_v43 = vunpack.i.h.bf16 %v1152_v39  ;;  %v1153_v44 = vunpack.i.l.bf16 %v1152_v39  ;;  %v1196_v39 = vpop.eup %1195 }
 0x3fb   :  { %v774_v40 = vmul.f32 32.0, %v1196_v39  ;;  %vm778_vm12 = vweird.f32 %v1196_v39 }
 0x3fc   :  { %v423_v48 = vsel %vm422_vm11, %v421_v46, %v1153_v44  ;;  %v662_v49 = vsel %vm422_vm11, %v661_v47, %v1154_v43 }
 0x3fd   :  { %v663_v50 = vpack.c.bf16 %v662_v49, %v423_v48  ;;  %v775_v41 = vsub.f32 1.0, %v774_v40 }
 0x3ff   :  { %1081 = vmatmul.msk.bf16.vlgmr.msra.gmra.mxu0 %vm163_vm7, %v663_v50  ;;  %v776_v43 = vmul.f32 %v1196_v39, %v775_v41 }
 0x401   :  { %v777_v44 = vadd.f32 %v1196_v39, %v776_v43 }
 0x403   :  { %v1646_v46 = vsel %vm778_vm12, %v1196_v39, %v777_v44 }
 0x47c   :  { %v696_v52 = vpop.f32.mrf.mxu0 }
 0x47d   :  { %v697_v53 = vadd.f32 %v1156_v51, %v696_v52 }
 0x47f   :  { %v701_v54 = vperm.slane %v697_v53, 0 }
 0x481   :  { %v703_v55 = vadd.f32 %v701_v54, %v1424_v3  ;;  %v704_v56 = vadd.f32 %v701_v54, %v1429_v4  ;;  %v705_v57 = vadd.f32 %v701_v54, %v1434_v5  ;;  %v706_v58 = vadd.f32 %v701_v54, %v1439_v6 }
 0x482   :  { %v702_v59 = vadd.f32 %v701_v54, %v1419_v2  ;;  %v707_v60 = vadd.f32 %v701_v54, %v1444_v7  ;;  %v708_v0 = vadd.f32 %v701_v54, %v1449_v8  ;;  %v709_v42 = vadd.f32 %v701_v54, %v1454_v9 }
 0x483   :  { %v727_v61 = vrot.slane %v703_v55, 7  ;;  %v729_v62 = vrot.slane %v704_v56, 6  ;;  %v731_v11 = vrot.slane %v705_v57, 5  ;;  %v733_v13 = vrot.slane %v706_v58, 4  ;;  %v1113_v58 = vld [vmem:[#allocation2 + $0x8] sm:$0xff] }
 0x484   :  { %v698_v63 = vpop.f32.mrf.mxu0  ;;  %v735_v16 = vrot.slane %v707_v60, 3  ;;  %v737_v18 = vrot.slane %v708_v0, 2  ;;  %v739_v20 = vrot.slane %v709_v42, 1  ;;  %858 = vmatpush.bf16.msra.mxu1 %v1113_v58 }
 0x485   :  { %v699_v1 = vadd.f32 %v1156_v51, %v698_v63  ;;  %v728_v10 = vsel %vm106_vm0, %v727_v61, %v702_v59  ;;  %v1112_v61 = vld [vmem:[#allocation2] sm:$0xff] }
 0x486   :  { %v730_v12 = vsel %vm109_vm1, %v729_v62, %v728_v10 }
 0x487   :  { %v710_v14 = vperm.slane %v699_v1, 0  ;;  %v732_v15 = vsel %vm112_vm2, %v731_v11, %v730_v12 }
 0x488   :  { %v734_v17 = vsel %vm115_vm3, %v733_v13, %v732_v15  ;;  %859 = vmatpush.bf16.msra.mxu1 %v1112_v61 }
 0x489   :  { %v736_v19 = vsel %vm118_vm4, %v735_v16, %v734_v17  ;;  %v711_v21 = vadd.f32 %v710_v14, %v1419_v2  ;;  %v713_v22 = vadd.f32 %v710_v14, %v1429_v4  ;;  %v714_v25 = vadd.f32 %v710_v14, %v1434_v5 }
 0x48a   :  { %v738_v24 = vsel %vm121_vm5, %v737_v18, %v736_v19  ;;  %v715_v23 = vadd.f32 %v710_v14, %v1439_v6  ;;  %v712_v27 = vadd.f32 %v710_v14, %v1424_v3  ;;  %v716_v28 = vadd.f32 %v710_v14, %v1444_v7 }
 0x48b   :  { %v740_v26 = vsel %vm124_vm6, %v739_v20, %v738_v24  ;;  %v750_v29 = vrot.slane %v711_v21, 1  ;;  %v717_v31 = vadd.f32 %v710_v14, %v1449_v8  ;;  %v752_v2 = vrot.slane %v713_v22, 7  ;;  %v1157_v20 = vld [vmem:[%s1711_s5] ss:$0 sm:$0xff] }
 0x48c   :  { %v767_v30 = vsel %vm163_vm7, %v740_v26, 0.0  ;;  %v718_v4 = vadd.f32 %v710_v14, %v1454_v9  ;;  %v754_v5 = vrot.slane %v714_v25, 6  ;;  %v756_v33 = vrot.slane %v715_v23, 5  ;;  %v1158_v25 = vld [vmem:[%s1712_s6] ss:$0 sm:$0xff] }
 0x48d   :  { %768 = vadd.xlane.f32.xlu1 %v767_v30  ;;  %v751_v32 = vsel %vm106_vm0, %v712_v27, %v750_v29  ;;  %v758_v3 = vrot.slane %v716_v28, 4  ;;  %v760_v35 = vrot.slane %v717_v31, 3  ;;  %v1117_v31 = vld [vmem:[%s1715_s9 + $0x18] sm:$0xff] }
 0x48e   :  { %v753_v6 = vsel %vm109_vm1, %v752_v2, %v751_v32  ;;  %v762_v37 = vrot.slane %v718_v4, 2  ;;  %913 = vmatpush.bf16.msra.mxu3 %v1117_v31  ;;  %v1116_v2 = vld [vmem:[%s1715_s9 + $0x10] sm:$0xff]  ;;  %v1115_v4 = vld [vmem:[%s1715_s9 + $0x8] sm:$0xff]  ;;  %v1114_v32 = vld [vmem:[%s1715_s9] sm:$0xff] }
 0x48f   :  { %v755_v34 = vsel %vm112_vm2, %v754_v5, %v753_v6  ;;  %v1159_v6 = vld [vmem:[#allocation5] ss:$0 sm:$0xff] }
 0x490   :  { %v757_v7 = vsel %vm115_vm3, %v756_v33, %v755_v34  ;;  %vm905_vm3 = vcmask 523264  }
 0x491   :  { %v759_v36 = vsel %vm118_vm4, %v758_v3, %v757_v7 }
 0x492   :  { %v761_v8 = vsel %vm121_vm5, %v760_v35, %v759_v36  ;;  %914 = vmatpush.bf16.msra.mxu3 %v1116_v2 }
 0x493   :  { %v763_v45 = vsel %vm124_vm6, %v762_v37, %v761_v8  ;;  %v1160_v37 = vld [vmem:[#allocation7] ss:$0 sm:$0xff] }
 0x494   :  { %v770_v9 = vsel %vm163_vm7, %v763_v45, 0.0 }
 0x495   :  { %771 = vadd.xlane.f32.xlu2 %v770_v9 }
 0x496   :  { %915 = vmatpush.bf16.msra.mxu3 %v1115_v4 }
 0x49a   :  { %916 = vmatpush.bf16.msra.mxu3 %v1114_v32 }
 0x500   :  { %v769_v47 = vpop.xlane.xlu1 %768 }
 0x501   :  { %v780_v48 = vmul.f32 %v1646_v46, %v769_v47 }
 0x503   :  { %v782_v49 = vsub.f32 %v740_v26, %v780_v48 }
 0x505   :  { %v784_v50 = vmul.f32 %v782_v49, %v782_v49 }
 0x507   :  { %v786_v51 = vsel %vm163_vm7, %v784_v50, 0.0 }
 0x508   :  { %v772_v52 = vpop.xlane.xlu2 %771  ;;  %787 = vadd.xlane.f32.xlu0 %v786_v51 }
 0x509   :  { %v781_v53 = vmul.f32 %v1646_v46, %v772_v52 }
 0x50b   :  { %v783_v54 = vsub.f32 %v763_v45, %v781_v53 }
 0x50d   :  { %v785_v55 = vmul.f32 %v783_v54, %v783_v54 }
 0x50f   :  { %v789_v56 = vsel %vm163_vm7, %v785_v55, 0.0 }
 0x510   :  { %790 = vadd.xlane.f32.xlu2 %v789_v56 }
 0x57b   :  { %v788_v57 = vpop.xlane.xlu0 %787 }
 0x57c   :  { %v792_v59 = vmul.f32 %v788_v57, %v1646_v46 }
 0x57e   :  { %v794_v60 = vadd.f32 1e-05, %v792_v59 }
 0x580   :  { %1197 = vrsqrt.f32 %v794_v60  ;;  %vm802_vm14 = vweird.f32 %v794_v60 }
 0x583   :  { %v791_v62 = vpop.xlane.xlu2 %790 }
 0x584   :  { %v793_v63 = vmul.f32 %v791_v62, %v1646_v46 }
 0x586   :  { %v1198_v0 = vpop.eup %1197  ;;  %v795_v1 = vadd.f32 1e-05, %v793_v63 }
 0x587   :  { %v797_v42 = vmul.f32 %v1198_v0, %v794_v60  ;;  %vm803_vm13 = vweird.f32 %v1198_v0 }
 0x588   :  { %1199 = vrsqrt.f32 %v795_v1  ;;  %vm804_vm15 = vmor %vm802_vm14, %vm803_vm13  ;;  %vm812_vm1 = vweird.f32 %v795_v1 }
 0x589   :  { %v798_v10 = vmul.f32 %v1198_v0, %v797_v42 }
 0x58b   :  { %v799_v11 = vmul.f32 0.5, %v798_v10 }
 0x58d   :  { %v800_v12 = vsub.f32 1.5, %v799_v11 }
 0x58e   :  { %v1200_v13 = vpop.eup %1199 }
 0x58f   :  { %v801_v14 = vmul.f32 %v1198_v0, %v800_v12  ;;  %v807_v15 = vmul.f32 %v1200_v13, %v795_v1  ;;  %vm813_vm0 = vweird.f32 %v1200_v13 }
 0x590   :  { %vm814_vm2 = vmor %vm812_vm1, %vm813_vm0 }
 0x591   :  { %v808_v16 = vmul.f32 %v1200_v13, %v807_v15  ;;  %v805_v17 = vsel %vm804_vm15, %v1198_v0, %v801_v14 }
 0x592   :  { %v816_v21 = vmul.f32 %v805_v17, %v782_v49 }
 0x593   :  { %v809_v18 = vmul.f32 0.5, %v808_v16 }
 0x594   :  { %v821_v23 = vmul.f32 %v1157_v20, %v816_v21 }
 0x595   :  { %v810_v19 = vsub.f32 1.5, %v809_v18 }
 0x596   :  { %v826_v28 = vadd.f32 %v1158_v25, %v821_v23 }
 0x597   :  { %v811_v22 = vmul.f32 %v1200_v13, %v810_v19 }
 0x599   :  { %v815_v24 = vsel %vm814_vm2, %v1200_v13, %v811_v22  ;;  %v1161_v13 = vld [vmem:[%s1717_s11] ss:$0 sm:$0xff]  ;;  %s1326_s11 = smov [#allocation8]  }
 0x59a   :  { %v817_v26 = vmul.f32 %v815_v24, %v783_v54 }
 0x59c   :  { %v822_v27 = vmul.f32 %v1157_v20, %v817_v26 }
 0x59e   :  { %v827_v29 = vadd.f32 %v1158_v25, %v822_v27 }
 0x5a0   :  { %v828_v30 = vpack.c.bf16 %v827_v29, %v826_v28 }
 0x5a2   :  { %1090 = vmatmul.msk.bf16.vlgmr.msra.gmra.mxu1 %vm163_vm7, %v828_v30 }
 0x61f   :  { %v861_v5 = vpop.f32.mrf.mxu1 }
 0x620   :  { %v862_v33 = vadd.f32 %v1159_v6, %v861_v5 }
 0x622   :  { %v866_v7 = vmax.f32 %v862_v33, 0.0 }
 0x627   :  { %v863_v34 = vpop.f32.mrf.mxu1 }
 0x628   :  { %v864_v3 = vadd.f32 %v1159_v6, %v863_v34 }
 0x62a   :  { %v867_v35 = vmax.f32 %v864_v3, 0.0 }
 0x62c   :  { %v868_v36 = vpack.c.bf16 %v867_v35, %v866_v7 }
 0x62e   :  { %1107 = vmatmul.msk.bf16.vlgmr.msra.gmra.mxu3 %vm905_vm3, %v868_v36 }
 0x6b1   :  { %v918_v8 = vpop.f32.mrf.mxu3 }
 0x6b2   :  { %v919_v45 = vadd.f32 %v1160_v37, %v918_v8 }
 0x6b4   :  { %v923_v9 = vadd.f32 %v919_v45, %v826_v28 }
 0x6b6   :  { %v927_v38 = vsel %vm163_vm7, %v923_v9, 0.0 }
 0x6b7   :  { %928 = vadd.xlane.f32.xlu2 %v927_v38 }
 0x6b9   :  { %v920_v39 = vpop.f32.mrf.mxu3 }
 0x6ba   :  { %v921_v40 = vadd.f32 %v1160_v37, %v920_v39 }
 0x6bc   :  { %v924_v41 = vadd.f32 %v921_v40, %v827_v29 }
 0x6be   :  { %v930_v43 = vsel %vm163_vm7, %v924_v41, 0.0 }
 0x6bf   :  { %931 = vadd.xlane.f32.xlu2 %v930_v43 }
 0x72a   :  { %v929_v44 = vpop.xlane.xlu2 %928 }
 0x72b   :  { %v933_v47 = vmul.f32 %v929_v44, %v1646_v46 }
 0x72d   :  { %v935_v48 = vsub.f32 %v923_v9, %v933_v47 }
 0x72f   :  { %v937_v49 = vmul.f32 %v935_v48, %v935_v48 }
 0x731   :  { %v939_v50 = vsel %vm163_vm7, %v937_v49, 0.0 }
 0x732   :  { %940 = vadd.xlane.f32.xlu2 %v939_v50  ;;  %v932_v51 = vpop.xlane.xlu2 %931 }
 0x733   :  { %v934_v52 = vmul.f32 %v932_v51, %v1646_v46 }
 0x735   :  { %v936_v53 = vsub.f32 %v924_v41, %v934_v52 }
 0x737   :  { %v938_v54 = vmul.f32 %v936_v53, %v936_v53 }
 0x739   :  { %v942_v55 = vsel %vm163_vm7, %v938_v54, 0.0  ;;  %vm996_vm7 = vcmask 253952  }
 0x73a   :  { %943 = vadd.xlane.f32.xlu1 %v942_v55 }
 0x7a5   :  { %v941_v56 = vpop.xlane.xlu2 %940 }
 0x7a6   :  { %v945_v57 = vmul.f32 %v941_v56, %v1646_v46 }
 0x7a8   :  { %v947_v58 = vadd.f32 1e-05, %v945_v57 }
 0x7aa   :  { %1201 = vrsqrt.f32 %v947_v58  ;;  %vm955_vm5 = vweird.f32 %v947_v58 }
 0x7ad   :  { %v944_v59 = vpop.xlane.xlu1 %943 }
 0x7ae   :  { %v946_v60 = vmul.f32 %v944_v59, %v1646_v46  ;;  %v1162_v46 = vld [vmem:[%s1718_s12] ss:$0 sm:$0xff]  ;;  %s1032_s12 = sshll.u32 %s1326_s11, 4  ;;  %s1033_s12 = int_to_ptr.vmem [resolvable:$true] %s1032_s12 }
 0x7b0   :  { %v1202_v61 = vpop.eup %1201  ;;  %v948_v62 = vadd.f32 1e-05, %v946_v60 }
 0x7b1   :  { %v950_v63 = vmul.f32 %v1202_v61, %v947_v58  ;;  %vm956_vm4 = vweird.f32 %v1202_v61 }
 0x7b2   :  { %1203 = vrsqrt.f32 %v948_v62  ;;  %vm957_vm6 = vmor %vm955_vm5, %vm956_vm4  ;;  %vm965_vm9 = vweird.f32 %v948_v62 }
 0x7b3   :  { %v951_v0 = vmul.f32 %v1202_v61, %v950_v63 }
 0x7b5   :  { %v952_v1 = vmul.f32 0.5, %v951_v0 }
 0x7b7   :  { %v953_v42 = vsub.f32 1.5, %v952_v1 }
 0x7b8   :  { %v1204_v10 = vpop.eup %1203 }
 0x7b9   :  { %v954_v11 = vmul.f32 %v1202_v61, %v953_v42  ;;  %v960_v12 = vmul.f32 %v1204_v10, %v948_v62  ;;  %vm966_vm8 = vweird.f32 %v1204_v10 }
 0x7ba   :  { %vm967_vm10 = vmor %vm965_vm9, %vm966_vm8 }
 0x7bb   :  { %v958_v14 = vsel %vm957_vm6, %v1202_v61, %v954_v11  ;;  %v961_v15 = vmul.f32 %v1204_v10, %v960_v12 }
 0x7bc   :  { %v969_v16 = vmul.f32 %v958_v14, %v935_v48 }
 0x7bd   :  { %v962_v17 = vmul.f32 0.5, %v961_v15 }
 0x7be   :  { %v974_v18 = vmul.f32 %v1161_v13, %v969_v16 }
 0x7bf   :  { %v963_v19 = vsub.f32 1.5, %v962_v17 }
 0x7c0   :  { %v979_v20 = vadd.f32 %v1162_v46, %v974_v18 }
 0x7c1   :  { %v964_v21 = vmul.f32 %v1204_v10, %v963_v19 }
 0x7c2   :  { %v982_v22 = vrot.slane %v979_v20, 1  ;;  %v983_v24 = vrot.slane %v979_v20, 2  ;;  %v984_v25 = vrot.slane %v979_v20, 3  ;;  %997 = vst.msk [vmem:[#allocation8] sm:$0x1] %vm996_vm7, %v979_v20  ;;  %v985_v23 = vrot.slane %v979_v20, 4 }
 0x7c3   :  { %v968_v26 = vsel %vm967_vm10, %v1204_v10, %v964_v21  ;;  %v986_v27 = vrot.slane %v979_v20, 5  ;;  %v987_v29 = vrot.slane %v979_v20, 6  ;;  %v988_v30 = vrot.slane %v979_v20, 7 }
 0x7c4   :  { %998 = vst.msk [vmem:[#allocation8 + $0x2] sm:$0x1] %vm996_vm7, %v982_v22  ;;  %v970_v28 = vmul.f32 %v968_v26, %v936_v53 }
 0x7c5   :  { %999 = vst.msk [vmem:[#allocation8 + $0x4] sm:$0x1] %vm996_vm7, %v983_v24 }
 0x7c6   :  { %1000 = vst.msk [vmem:[#allocation8 + $0x6] sm:$0x1] %vm996_vm7, %v984_v25  ;;  %v975_v31 = vmul.f32 %v1161_v13, %v970_v28 }
 0x7c7   :  { %1001 = vst.msk [vmem:[#allocation8 + $0x8] sm:$0x1] %vm996_vm7, %v985_v23 }
 0x7c8   :  { %1002 = vst.msk [vmem:[#allocation8 + $0xa] sm:$0x1] %vm996_vm7, %v986_v27  ;;  %v980_v2 = vadd.f32 %v1162_v46, %v975_v31 }
 0x7c9   :  { %1003 = vst.msk [vmem:[#allocation8 + $0xc] sm:$0x1] %vm996_vm7, %v987_v29 }
 0x7ca   :  { %1004 = vst.msk [vmem:[#allocation8 + $0xe] sm:$0x1] %vm996_vm7, %v988_v30  ;;  %v1006_v4 = vrot.slane %v980_v2, 1  ;;  %v1007_v32 = vrot.slane %v980_v2, 2  ;;  %v1008_v5 = vrot.slane %v980_v2, 3  ;;  %v1009_v6 = vrot.slane %v980_v2, 4 }
 0x7cb   :  { %1020 = vst.msk [vmem:[#allocation8 + $0x1] sm:$0x1] %vm996_vm7, %v980_v2  ;;  %v1010_v33 = vrot.slane %v980_v2, 5  ;;  %v1011_v34 = vrot.slane %v980_v2, 6  ;;  %v1012_v3 = vrot.slane %v980_v2, 7 }
 0x7cc   :  { %1021 = vst.msk [vmem:[#allocation8 + $0x3] sm:$0x1] %vm996_vm7, %v1006_v4 }
 0x7cd   :  { %1022 = vst.msk [vmem:[#allocation8 + $0x5] sm:$0x1] %vm996_vm7, %v1007_v32 }
 0x7ce   :  { %1023 = vst.msk [vmem:[#allocation8 + $0x7] sm:$0x1] %vm996_vm7, %v1008_v5 }
 0x7cf   :  { %1024 = vst.msk [vmem:[#allocation8 + $0x9] sm:$0x1] %vm996_vm7, %v1009_v6 }
 0x7d0   :  { %1025 = vst.msk [vmem:[#allocation8 + $0xb] sm:$0x1] %vm996_vm7, %v1010_v33 }
 0x7d1   :  { %1026 = vst.msk [vmem:[#allocation8 + $0xd] sm:$0x1] %vm996_vm7, %v1011_v34 }
 0x7d2   :  { %1027 = vst.msk [vmem:[#allocation8 + $0xf] sm:$0x1] %vm996_vm7, %v1012_v3 }
 0x7d3   :  { %1040 = dma.vmem_to_hbm [thread:$0]  %s1033_s12, 256, %s1035_s14, [#allocation4], %s1327_s18, %s1327_s18, %s1328_s15  }
 0x7d4   :  { %1305 = dma.done.wait [#allocation4], 256  }
 0x7d5   :  { %1306 = vsyncadd [#allocation4], 4294967040 }
 0x7d6   :  { %1045 = vsyncpa [#allocation3], 1 }
 0x7d7   :  { %1046 = vsyncpa [#allocation6], 1 }
 0x7d8   :  { %1047 = vsyncpa [#allocation4], 1 }

</bundles_post_ra>
